<compile_context>
chip_gen: v7x
topology: tpu7x:2x2x1
jax: 0.10.0
libtpu: 0.0.40
codegen_flags: <defaults>
</compile_context>

<pallas_src>
import math
import numpy as np

import jax
import jax.numpy as jnp
from jax.experimental import pallas as pl
from jax.experimental.pallas import tpu as pltpu


def _round_up(v, m):
    return ((v + m - 1) // m) * m


# ----------------------------------------------------------------------------
# Pallas kernel: one (level, image) block of R ROIs x one C tile per grid step.
# ----------------------------------------------------------------------------
def _make_block_roi_align_kernel(Hp, Wp, RP):
    HWp = Hp * Wp

    def kernel(bix_ref, wtab_ref, feat_ref, out_ref, wfull_ref):
        # bix_ref (SMEM scalar prefetch) is only consumed by the index_maps.
        del bix_ref
        c_idx = pl.program_id(1)

        # Build the fused bilinear weight matrix once per ROI block; reuse it
        # for every C tile of this block.
        @pl.when(c_idx == 0)
        def _():
            wt = wtab_ref[...]                    # (1, Hp+Wp, RP) f32
            wy = wt[0, :Hp, :]                    # (Hp, RP) separable y weights
            wx = wt[0, Hp:, :]                    # (Wp, RP) separable x weights (1/count folded)
            wfull = (wy[:, None, :] * wx[None, :, :]).reshape(HWp, RP)
            wfull_ref[...] = wfull.astype(wfull_ref.dtype)

        # Single MXU matmul does both spatial contractions for all R ROIs.
        acc = jnp.dot(feat_ref[...], wfull_ref[...],
                      preferred_element_type=jnp.float32)     # (ct, RP) f32
        out_ref[...] = acc[None].astype(out_ref.dtype)

    return kernel


def _pick_vmem_limit(feat_tile, wtab_tile, out_tile, wfull_bytes, inter_bytes):
    """Size the scoped VMEM limit from the actual buffers (per-generation cap)."""
    need = (2 * feat_tile + 2 * wtab_tile + 2 * out_tile
            + wfull_bytes + inter_bytes + (4 << 20))
    try:
        cap = int(getattr(pltpu.get_tpu_info(), "vmem_capacity_bytes", 64 << 20))
    except Exception:
        cap = 64 << 20
    hi = max(cap - (16 << 20), 32 << 20)
    return int(min(max(need, 32 << 20), hi))


def _roi_align_level_pallas(feat_l, wtab, block_bix, Hp, Wp, RP,
                            ct, n_ct, out_dtype, compute_dtype):
    """feat_l: (B, C, Hp*Wp) compute_dtype, wtab: (NB, Hp+Wp, RP) f32,
       block_bix: (NB,) int32.  Returns (NB, C, RP) out_dtype."""
    B, C, HWp = feat_l.shape
    NB = wtab.shape[0]
    HWrows = Hp + Wp
    kernel = _make_block_roi_align_kernel(Hp, Wp, RP)

    vmem_limit = _pick_vmem_limit(
        feat_tile=ct * HWp * feat_l.dtype.itemsize,
        wtab_tile=HWrows * RP * 4,
        out_tile=ct * RP * jnp.dtype(out_dtype).itemsize,
        wfull_bytes=HWp * RP * jnp.dtype(compute_dtype).itemsize,
        inter_bytes=Hp * Wp * RP * 4)

    grid_spec = pltpu.PrefetchScalarGridSpec(
        num_scalar_prefetch=1,                   # per-block batch index -> SMEM
        grid=(NB, n_ct),
        in_specs=[
            # per-block separable weight table (lane-dense, RP % 128 == 0);
            # same block index for every C tile -> DMA de-duplicated.
            pl.BlockSpec((1, HWrows, RP), lambda b, c, bix: (b, 0, 0)),
            # feature slab C-tile of this block's image.
            pl.BlockSpec((pl.Squeezed(), ct, HWp), lambda b, c, bix: (bix[b], c, 0)),
        ],
        out_specs=pl.BlockSpec((1, ct, RP), lambda b, c, bix: (b, c, 0)),
        scratch_shapes=[pltpu.VMEM((HWp, RP), compute_dtype)],   # fused w_full
    )

    return pl.pallas_call(
        kernel,
        out_shape=jax.ShapeDtypeStruct((NB, C, RP), out_dtype),
        grid_spec=grid_spec,
        compiler_params=pltpu.CompilerParams(
            # blocks independent -> megacore on v7x; C axis carries the w_full
            # scratch -> must stay sequential ("arbitrary").
            dimension_semantics=("parallel", "arbitrary"),
            vmem_limit_bytes=vmem_limit),
    )(block_bix, wtab, feat_l)


# ----------------------------------------------------------------------------
# Module wrapper (glue: level mapping, host-side block scheduling, un-permute)
# ----------------------------------------------------------------------------
class MultiScaleRoIAlignPallas:
    def __init__(self, output_size, sampling_ratio, scales,
                 canonical_scale=224, canonical_level=4, eps=1e-6,
                 roi_block=8, c_tile=128, compute_dtype=jnp.bfloat16):
        if isinstance(output_size, int):
            output_size = (output_size, output_size)
        self.output_size = tuple(int(v) for v in output_size)
        self.sampling_ratio = int(sampling_ratio)
        # Separable-weight ROIAlign matches torchvision only for aligned=False
        # and a fixed sampling grid.
        assert self.sampling_ratio > 0, "sampling_ratio <= 0 (adaptive) unsupported"
        self.scales = [float(s) for s in scales]
        self.k_min = int(round(-math.log2(self.scales[0])))
        self.k_max = int(round(-math.log2(self.scales[-1])))
        self.s0 = float(canonical_scale)
        self.lvl0 = float(canonical_level)
        self.eps = float(eps)
        self.roi_block = int(roi_block)      # raise to 16-32 for dense ROI loads
        self.c_tile = int(c_tile)
        self.compute_dtype = compute_dtype   # bf16 matmul operands, f32 accumulate

    def _map_levels_np(self, concat_boxes):
        # LevelMapper heuristic (FPN paper)
        s = np.sqrt(np.maximum(
            (concat_boxes[:, 2] - concat_boxes[:, 0]) *
            (concat_boxes[:, 3] - concat_boxes[:, 1]), 1e-12))
        target = np.floor(self.lvl0 + np.log2(s / self.s0) + self.eps)
        target = np.clip(target, self.k_min, self.k_max)
        return (target - self.k_min).astype(np.int64)

    def __call__(self, x_filtered, boxes):
        """x_filtered: list of per-level NCHW feature maps (same B, C).
           boxes: list (per image) of (Ni, 4) boxes in image coords (x1,y1,x2,y2)."""
        out_h, out_w = self.output_size
        P = out_h * out_w
        R = self.roi_block
        sr = self.sampling_ratio
        L = len(x_filtered)
        B, C = int(x_filtered[0].shape[0]), int(x_filtered[0].shape[1])
        out_dtype = x_filtered[0].dtype

        # Column padding so R*Ppad is a multiple of 128 (unmasked lane-dense stores).
        col_align = 128 // math.gcd(R, 128)
        Ppad = _round_up(P, col_align)
        RP = R * Ppad

        # Channel tiling (bounds per-step VMEM for production channel counts).
        if C <= self.c_tile:
            ct, n_ct = C, 1
        elif C % self.c_tile == 0:
            ct, n_ct = self.c_tile, C // self.c_tile
        else:
            # TODO(synk): pad C to a multiple of the tile for odd channel counts.
            ct, n_ct = C, 1

        boxes_np = [np.asarray(b, dtype=np.float32).reshape(-1, 4) for b in boxes]
        num_rois = int(sum(b.shape[0] for b in boxes_np))
        if num_rois == 0:
            return jnp.zeros((0, C, out_h, out_w), out_dtype)

        concat = np.concatenate(boxes_np, axis=0)
        batch_idx = np.concatenate(
            [np.full((b.shape[0],), i, dtype=np.int64)
             for i, b in enumerate(boxes_np)])
        levels = (self._map_levels_np(concat) if L > 1
                  else np.zeros((num_rois,), np.int64))

        ph_idx = np.arange(out_h, dtype=np.float64)
        pw_idx = np.arange(out_w, dtype=np.float64)
        offs = (np.arange(sr, dtype=np.float64) + 0.5) / sr
        inv_count = 1.0 / float(sr * sr)

        gather_idx = np.zeros((num_rois,), np.int64)
        pooled_parts = []
        row_offset = 0

        for lvl in range(L):
            in_lvl = np.nonzero(levels == lvl)[0]
            if in_lvl.size == 0:
                continue
            n = in_lvl.size
            Hl = int(x_filtered[lvl].shape[2])
            Wl = int(x_filtered[lvl].shape[3])
            # Pad W (sublane dim of the 2-D weight grid) to 8 and the flattened
            # K dim to a multiple of 128 (no masked loads / relayout copies).
            Wp = _round_up(Wl, 8)
            Hp = _round_up(Hl, 8)
            while (Hp * Wp) % 128 != 0:
                Hp += 8
            scale = self.scales[lvl]

            # ---- vectorized per-ROI separable bilinear weights (host) ----
            # torchvision roi_align, aligned=False, sampling_ratio > 0.
            rois = concat[in_lvl].astype(np.float64) * scale
            x1, y1, x2, y2 = rois[:, 0], rois[:, 1], rois[:, 2], rois[:, 3]
            roi_w = np.maximum(x2 - x1, 1.0)
            roi_h = np.maximum(y2 - y1, 1.0)
            bin_h = (roi_h / out_h)[:, None, None]
            bin_w = (roi_w / out_w)[:, None, None]

            cy = y1[:, None, None] + (ph_idx[None, :, None] + offs[None, None, :]) * bin_h
            vy = ((cy >= -1.0) & (cy <= float(Hl))).astype(np.float64)
            cyc = np.clip(cy, 0.0, float(Hl) - 1.0)
            gy = np.arange(Hp, dtype=np.float64)
            wy = (np.maximum(0.0, 1.0 - np.abs(cyc[..., None] - gy))
                  * vy[..., None]).sum(axis=2)                         # (n, out_h, Hp)

            cx = x1[:, None, None] + (pw_idx[None, :, None] + offs[None, None, :]) * bin_w
            vx = ((cx >= -1.0) & (cx <= float(Wl))).astype(np.float64)
            cxc = np.clip(cx, 0.0, float(Wl) - 1.0)
            gx = np.arange(Wp, dtype=np.float64)
            wx = (np.maximum(0.0, 1.0 - np.abs(cxc[..., None] - gx))
                  * vx[..., None]).sum(axis=2) * inv_count             # (n, out_w, Wp)

            # Per-output-column factors (column = slot*Ppad + ph*out_w + pw).
            wy_elem = np.zeros((n, Ppad, Hp), np.float32)
            wy_elem[:, :P, :] = np.repeat(wy, out_w, axis=1)
            wx_elem = np.zeros((n, Ppad, Wp), np.float32)
            wx_elem[:, :P, :] = np.tile(wx, (1, out_h, 1))

            # ---- pack (level, image) blocks of R ROIs ----
            batch_of = batch_idx[in_lvl]
            wtab_blocks = []
            block_bix = []
            for b in range(B):
                pos = np.nonzero(batch_of == b)[0]
                for s in range(0, pos.size, R):
                    chunk = pos[s:s + R]
                    k = chunk.size
                    block_no = len(block_bix)
                    wtab = np.zeros((Hp + Wp, RP), np.float32)
                    wtab[:Hp, :k * Ppad] = (
                        wy_elem[chunk].transpose(2, 0, 1).reshape(Hp, k * Ppad))
                    wtab[Hp:, :k * Ppad] = (
                        wx_elem[chunk].transpose(2, 0, 1).reshape(Wp, k * Ppad))
                    wtab_blocks.append(wtab)
                    block_bix.append(b)
                    gather_idx[in_lvl[chunk]] = (
                        row_offset + block_no * R + np.arange(k))
            NB = len(block_bix)

            wtab_l = jnp.asarray(np.stack(wtab_blocks, axis=0))          # (NB, Hp+Wp, RP)
            bix_l = jnp.asarray(np.asarray(block_bix, dtype=np.int32))   # (NB,)

            feat = x_filtered[lvl]
            feat_p = jnp.pad(feat, ((0, 0), (0, 0), (0, Hp - Hl), (0, Wp - Wl)))
            feat_l = feat_p.reshape(B, C, Hp * Wp).astype(self.compute_dtype)

            pooled = _roi_align_level_pallas(
                feat_l, wtab_l, bix_l, Hp, Wp, RP, ct, n_ct,
                out_dtype, self.compute_dtype)                           # (NB, C, RP)
            pooled = pooled.reshape(NB, C, R, Ppad)[:, :, :, :P]
            pooled = pooled.transpose(0, 2, 1, 3).reshape(NB * R, C, out_h, out_w)
            pooled_parts.append(pooled)
            row_offset += NB * R

        all_pooled = jnp.concatenate(pooled_parts, axis=0)
        return jnp.take(all_pooled, jnp.asarray(gather_idx, dtype=jnp.int32), axis=0)


# ----------------------------------------------------------------------------
# Pure-numpy reference (torchvision roi_align semantics, aligned=False)
# ----------------------------------------------------------------------------
def _roi_align_ref_np(feats, rois_scaled, levels, batch_idx, out_h, out_w, sr):
    N = rois_scaled.shape[0]
    C = feats[0].shape[1]
    out = np.zeros((N, C, out_h, out_w), np.float32)
    for r in range(N):
        lvl = int(levels[r]); b = int(batch_idx[r])
        f = feats[lvl][b]                      # (C, H, W)
        H, W = f.shape[1], f.shape[2]
        x1, y1, x2, y2 = (float(v) for v in rois_scaled[r])
        roi_w = max(x2 - x1, 1.0); roi_h = max(y2 - y1, 1.0)
        bin_h = roi_h / out_h; bin_w = roi_w / out_w
        for ph in range(out_h):
            for pw in range(out_w):
                acc = np.zeros((C,), np.float64)
                for iy in range(sr):
                    y = y1 + ph * bin_h + (iy + 0.5) * bin_h / sr
                    for ix in range(sr):
                        x = x1 + pw * bin_w + (ix + 0.5) * bin_w / sr
                        if y < -1.0 or y > H or x < -1.0 or x > W:
                            continue
                        yy = min(max(y, 0.0), H - 1.0)
                        xx = min(max(x, 0.0), W - 1.0)
                        y0 = int(np.floor(yy)); x0 = int(np.floor(xx))
                        y1i = min(y0 + 1, H - 1); x1i = min(x0 + 1, W - 1)
                        ly = yy - y0; lx = xx - x0
                        acc += ((1 - ly) * (1 - lx) * f[:, y0, x0] +
                                (1 - ly) * lx * f[:, y0, x1i] +
                                ly * (1 - lx) * f[:, y1i, x0] +
                                ly * lx * f[:, y1i, x1i])
                out[r, :, ph, pw] = (acc / (sr * sr)).astype(np.float32)
    return out


# ----------------------------------------------------------------------------
if __name__ == "__main__":
    key = jax.random.PRNGKey(0)
    kf0, kf1, kb0, kb1 = jax.random.split(key, 4)

    B, C = 2, 16
    # two FPN levels: 256x256 image -> strides 8 and 16
    feat0 = jax.random.normal(kf0, (B, C, 32, 32), jnp.float32)
    feat1 = jax.random.normal(kf1, (B, C, 16, 16), jnp.float32)
    scales = [1.0 / 8.0, 1.0 / 16.0]

    def make_boxes(k):
        xy = jax.random.uniform(k, (2, 2), minval=5.0, maxval=80.0)
        wh = jax.random.uniform(jax.random.fold_in(k, 1), (2, 2),
                                minval=20.0, maxval=90.0)
        small = jnp.concatenate([xy, xy + wh], axis=1)                   # -> level 0
        large = jnp.array([[4.0, 6.0, 243.0, 240.0],
                           [10.0, 2.0, 250.0, 236.0]], jnp.float32)      # -> level 1
        return jnp.concatenate([small, large], axis=0).astype(jnp.float32)

    boxes = [make_boxes(kb0), make_boxes(kb1)]   # 4 boxes per image, 8 ROIs total

    pooler = MultiScaleRoIAlignPallas(output_size=7, sampling_ratio=2,
                                      scales=scales, roi_block=8,
                                      compute_dtype=jnp.bfloat16)
    out = pooler([feat0, feat1], boxes)
    out = jax.block_until_ready(out)

    # reference check (bf16 matmul operands, f32 accumulate -> ~1e-2 tolerance)
    concat_boxes = np.concatenate([np.asarray(b) for b in boxes], axis=0)
    batch_idx = np.concatenate([np.full((b.shape[0],), i, np.int64)
                                for i, b in enumerate(boxes)])
    s = np.sqrt((concat_boxes[:, 2] - concat_boxes[:, 0]) *
                (concat_boxes[:, 3] - concat_boxes[:, 1]))
    lvl = np.floor(4.0 + np.log2(s / 224.0) + 1e-6)
    lvl = np.clip(lvl, pooler.k_min, pooler.k_max).astype(np.int64) - pooler.k_min
    rois_scaled = concat_boxes * np.asarray(scales, np.float32)[lvl][:, None]
    ref = _roi_align_ref_np([np.asarray(feat0), np.asarray(feat1)],
                            rois_scaled, lvl, batch_idx, 7, 7, 2)

    np.testing.assert_allclose(np.asarray(out, dtype=np.float32), ref,
                               rtol=2e-2, atol=2e-2)
    print("KERNEL_OK")
</pallas_src>

<mosaic_0001>
module attributes {stable_mosaic.version = 11 : i64} {
  func.func @kernel(%arg0: i32, %arg1: i32, %arg2: memref<2xi32, #tpu.memory_space<smem>>, %arg3: memref<1x64x512xf32, #tpu.memory_space<vmem>>, %arg4: memref<1x16x1024xbf16, #tpu.memory_space<vmem>>, %arg5: memref<1x16x512xf32, #tpu.memory_space<vmem>>, %arg6: memref<1024x512xbf16, #tpu.memory_space<vmem>>) attributes {dimension_semantics = [#tpu.dimension_semantics<parallel>, #tpu.dimension_semantics<arbitrary>], iteration_bounds = array<i64: 2, 1>, scalar_prefetch = 1 : i64, scratch_operands = 1 : i64, tpu.core_type = #tpu.core_type<tc>, window_params = [{transform_indices = @transform_0, window_bounds = array<i64: 1, 64, 512>}, {transform_indices = @transform_1, window_bounds = array<i64: 1, 16, 1024>}, {transform_indices = @transform_2, window_bounds = array<i64: 1, 16, 512>}]} {
    %c0_i32 = arith.constant 0 : i32
    %0 = arith.cmpi eq, %arg1, %c0_i32 : i32
    %1 = arith.extui %0 : i1 to i32
    %c0_i32_0 = arith.constant 0 : i32
    %2 = arith.cmpi ne, %1, %c0_i32_0 : i32
    scf.if %2 {
      %c0_8 = arith.constant 0 : index
      %c0_9 = arith.constant 0 : index
      %c0_10 = arith.constant 0 : index
      %9 = vector.load %arg3[%c0_8, %c0_9, %c0_10] : memref<1x64x512xf32, #tpu.memory_space<vmem>>, vector<1x64x512xf32>
      %10 = vector.extract_strided_slice %9 {offsets = [0, 0, 0], sizes = [1, 32, 512], strides = [1, 1, 1]} : vector<1x64x512xf32> to vector<1x32x512xf32>
      %11 = vector.shape_cast %10 : vector<1x32x512xf32> to vector<32x512xf32>
      %12 = vector.extract_strided_slice %9 {offsets = [0, 32, 0], sizes = [1, 32, 512], strides = [1, 1, 1]} : vector<1x64x512xf32> to vector<1x32x512xf32>
      %13 = vector.shape_cast %12 : vector<1x32x512xf32> to vector<32x512xf32>
      %14 = vector.shape_cast %11 : vector<32x512xf32> to vector<32x1x512xf32>
      %15 = vector.shape_cast %13 : vector<32x512xf32> to vector<1x32x512xf32>
      %16 = vector.broadcast %14 : vector<32x1x512xf32> to vector<32x32x512xf32>
      %17 = vector.broadcast %15 : vector<1x32x512xf32> to vector<32x32x512xf32>
      %18 = arith.mulf %16, %17 : vector<32x32x512xf32>
      %19 = vector.shape_cast %18 : vector<32x32x512xf32> to vector<1024x512xf32>
      %20 = arith.truncf %19 : vector<1024x512xf32> to vector<1024x512xbf16>
      %c0_11 = arith.constant 0 : index
      %c0_12 = arith.constant 0 : index
      %21 = vector.load %arg6[%c0_11, %c0_12] : memref<1024x512xbf16, #tpu.memory_space<vmem>>, vector<1024x512xbf16>
      tpu.vector_store %arg6[%c0_11, %c0_12], %20 {strides = array<i32>} : memref<1024x512xbf16, #tpu.memory_space<vmem>>, vector<1024x512xbf16>,
    } else {
    }
    %c0 = arith.constant 0 : index
    %c0_1 = arith.constant 0 : index
    %c0_2 = arith.constant 0 : index
    %3 = vector.load %arg4[%c0, %c0_1, %c0_2] : memref<1x16x1024xbf16, #tpu.memory_space<vmem>>, vector<1x16x1024xbf16>
    %4 = vector.shape_cast %3 : vector<1x16x1024xbf16> to vector<16x1024xbf16>
    %c0_3 = arith.constant 0 : index
    %c0_4 = arith.constant 0 : index
    %5 = vector.load %arg6[%c0_3, %c0_4] : memref<1024x512xbf16, #tpu.memory_space<vmem>>, vector<1024x512xbf16>
    %cst = arith.constant dense<0.000000e+00> : vector<16x512xf32>
    %6 = tpu.matmul %4, %5, %cst {dimension_numbers = #tpu.dot_dimension_numbers<[1], [0], [0], [1], [0, 0, 1, 1], [], []>} : vector<16x1024xbf16>, vector<1024x512xbf16>, vector<16x512xf32> -> vector<16x512xf32>
    %7 = vector.shape_cast %6 : vector<16x512xf32> to vector<1x16x512xf32>
    %c0_5 = arith.constant 0 : index
    %c0_6 = arith.constant 0 : index
    %c0_7 = arith.constant 0 : index
    %8 = vector.load %arg5[%c0_5, %c0_6, %c0_7] : memref<1x16x512xf32, #tpu.memory_space<vmem>>, vector<1x16x512xf32>
    tpu.vector_store %arg5[%c0_5, %c0_6, %c0_7], %7 {strides = array<i32>} : memref<1x16x512xf32, #tpu.memory_space<vmem>>, vector<1x16x512xf32>,
    return
  }
  func.func @transform_0(%arg0: i32, %arg1: i32, %arg2: memref<2xi32, #tpu.memory_space<smem>>) -> (i32, i32, i32) {
    %c0_i32 = arith.constant 0 : i32
    %c0_i32_0 = arith.constant 0 : i32
    %c0_i32_1 = arith.constant 0 : i32
    return %arg0, %c0_i32, %c0_i32_0 : i32, i32, i32
  }
  func.func @transform_1(%arg0: i32, %arg1: i32, %arg2: memref<2xi32, #tpu.memory_space<smem>>) -> (i32, i32, i32) {
    %0 = arith.index_cast %arg0 : i32 to index
    %1 = memref.load %arg2[%0] : memref<2xi32, #tpu.memory_space<smem>>
    %c0_i32 = arith.constant 0 : i32
    %c0_i32_0 = arith.constant 0 : i32
    return %1, %arg1, %c0_i32 : i32, i32, i32
  }
  func.func @transform_2(%arg0: i32, %arg1: i32, %arg2: memref<2xi32, #tpu.memory_space<smem>>) -> (i32, i32, i32) {
    %c0_i32 = arith.constant 0 : i32
    %c0_i32_0 = arith.constant 0 : i32
    return %arg0, %arg1, %c0_i32 : i32, i32, i32
  }
}

</mosaic_0001>

<bundles_post_ra>
// kernel: tpu_custom_call.1
= control target key start
LH: loop header
LB: loop body
LE: loop exit
PB: predicated region body
PF: predicated region fallthrough
CT: control target
= control target key end

     0   :  { %s4869_s0 = inlined_call_operand.hbm [shape: s32[2], index: 0, kind: input, shape index: {}]   ;;  %s4870_s1 = inlined_call_operand.hbm [shape: f32[2,64,512], index: 1, kind: input, shape index: {}]   ;;  %s4871_s2 = inlined_call_operand.hbm [shape: bf16[2,16,1024], index: 2, kind: input, shape index: {}]   ;;  %s4872_s3 = inlined_call_operand.hbm [shape: f32[2,16,512], index: 3, kind: output, shape index: {}]  }
   0x1   :  { %4881 = sst [smem:[#allocation18_spill]] %s4870_s1  ;;  %s3214_s14 = scalar_lea.hbm %s4869_s0, 16 }
   0x2   :  { %p3215_p0 = scmp.ne.s32.totalorder %s4869_s0, %s3214_s14  ;;  %p3218_p1 = scmp.lt.u32.totalorder %s3214_s14, %s4869_s0 }
   0x4   :  { %p3220_p2 = pnand %p3218_p1, %p3215_p0 }
   0x6   :  { %3223 = shalt.err (!%p3220_p2)  }
   0x7   :  { %s3398_s19 = smov [#allocation4]  }
   0x8   :  { %9 = dma.hbm_to_smem %s4869_s0, 16, %s3398_s19, [#allocation3] }
   0x9   :  { %3348 = dma.done.wait [#allocation3], 16 }
   0xa   :  { %3349 = vsyncadd [#allocation3], 4294967280 }
   0xb   :  { %11 = sfence }
   0xc   :  { %12 = vsyncpa [#allocation6], 0 }
   0xd   :  { %14 = vsyncpa [#allocation6 + $0x1], 0 }
   0xe   :  { %15 = vsyncpa [#allocation9], 0 }
   0xf   :  { %17 = vsyncpa [#allocation9 + $0x1], 0 }
  0x10   :  { %18 = vsyncpa [#allocation7], 0 }
  0x11   :  { %20 = vsyncpa [#allocation7 + $0x1], 0  ;;  %s3439_s22 = smov 0   ;;  %s3441_s23 = smov 0  }
  0x12   :  { %s3443_s24 = smov 0   ;;  %s3445_s25 = smov 0  }
  0x13   :  { %s3447_s26 = smov 0   ;;  %s3449_s0 = smov 0  }
  0x14   :  { %s3451_s27 = smov 0   ;;  %s3453_s28 = smov 0  }
  0x15   :  { %s3455_s29 = smov 0  }
  0x16 LB: > { %s3003_s30 = sadd.s32 4294967295, %s3396_s29   ;;  %s3004_s4 = sadd.s32 4294967294, %s3396_s29   ;;  %s3396_s29 = sphi %s3455_s29, %s26_s29   ;;  %s3392_s28 = sphi %s3453_s28, %s4913_s28   ;;  %s3388_s27 = sphi %s3451_s27, %s4912_s27   ;;  %s3384_s0 = sphi %s3449_s0, %s4911_s0   ;;  %s3380_s26 = sphi %s3447_s26, %s4910_s26   ;;  %s3376_s25 = sphi %s3445_s25, %s4909_s25   ;;  %s3372_s24 = sphi %s3443_s24, %s4908_s24   ;;  %s3368_s23 = sphi %s3441_s23, %s4907_s23   ;;  %s3364_s22 = sphi %s3439_s22, %s4906_s22  }
  0x17   : > { %s38_s5 = sadd.s32 1, %s3392_s28  ;;  %s45_s6 = sadd.s32 1, %s3384_s0 }
  0x18   : > { %p40_p3 = scmp.ge.s32.totalorder %s38_s5, 2  ;;  %p52_p4 = scmp.ne.s32.totalorder %s3384_s0, %s3380_s26 }
  0x19   : > { %p4874_p5 = scmp.eq.s32.totalorder %s3396_s29, 0  ;;  %p58_p6 = scmp.ne.s32.totalorder %s3380_s26, %s3376_s25 }
  0x1a   : > { %s4915_s5 = smov (%p40_p3, %s38_s5), 0  ;;  %p3504_p8 = scmp.eq.s32.totalorder %s3003_s30, 0 }
  0x1b   : > { %4882 = sst [smem:[#allocation17_spill]] %s4915_s5  ;;  %p3500_p7 = por %p4874_p5, %p52_p4 }
  0x1c   : > { %s42_s9 = ssub.s32 %s3392_s28, %s4915_s5  ;;  %s3511_s10 = sld [smem:[#allocation4 + %s3392_s28]] }
  0x1d   : > { %p43_p9 = scmp.eq.s32.totalorder %s42_s9, 0  ;;  %p3518_p10 = por %p3504_p8, %p58_p6 }
  0x1e   : > { %s3523_s12 = sld [smem:[#allocation4 + %s4915_s5]]  ;;  %p114_p11 = scmp.eq.s32.totalorder %s3003_s30, 1 }
  0x1f   : > { %s4885_s11 = scalar_select %p3518_p10, 1, 0 }
  0x20   : > { %s3526_s13 = scalar_select %p43_p9, %s3384_s0, %s45_s6  }
  0x21   : > { %p3531_p12 = por %p114_p11, %p52_p4  ;;  %p120_p13 = scmp.eq.s32.totalorder %s3004_s4, 1 }
  0x22   : > { %p4873_p1 = scmp.lt.s32.totalorder %s3396_s29, 2  ;;  %s140_s16 = sand.u32 1, %s3384_s0  }
  0x23   : > { %s4886_s14 = scalar_select %p3531_p12, 1, 0 }
  0x24   : > { %p3540_p2 = por %p120_p13, %p58_p6  ;;  %s3007_s17 = sshll.u32 %s140_s16, 8 }
  0x25   : > { %s3030_s18 = sshll.u32 %s3392_s28, 12  ;;  %s4888_s1 = sld [smem:[#allocation18_spill]] }
  0x26   : > { %s4887_s15 = scalar_select %p3540_p2, 1, 0 }
  0x27   : > { %s144_s30 = scalar_lea.vmem [#allocation5], %s3007_s17  ;;  %p3557_p3 = pnand %p4873_p1, %p3500_p7 }
  0x28   : > { %s151_s4 = sshll.u32 %s144_s30, 4  ;;  %s3562_s9 = scalar_lea.sflag [#allocation6], %s140_s16  ;;  %s3551_s4 = int_to_ptr.vmem [resolvable:$true] %s151_s4 }
  0x29   : > { %p3226_p9 = pneg %p3557_p3 }
  0x2b   : > { %s3549_s21 = scalar_lea.hbm %s4888_s1, %s3030_s18  ;;  %s3229_s19 = scalar_lea.hbm %s4888_s1, 8192 }
  0x2c   : > { %s3224_s18 = scalar_lea.hbm %s3549_s21, 4096  ;;  %p3230_p7 = scmp.lt.u32.totalorder %s3549_s21, %s4888_s1 }
  0x2d   : > { %p3225_p6 = scmp.ne.s32.totalorder %s3549_s21, %s3224_s18  ;;  %p3231_p0 = scmp.lt.u32.totalorder %s3229_s19, %s3224_s18 }
  0x2e   : > { %p3233_p5 = scmp.lt.u32.totalorder %s3224_s18, %s3549_s21 }
  0x2f   : > { %p3227_p11 = pnand %p3226_p9, %p3225_p6  ;;  %p3232_p1 = por %p3231_p0, %p3230_p7 }
  0x31   : > { %p3228_p13 = pneg %p3227_p11  ;;  %p3234_p4 = por %p3233_p5, %p3232_p1 }
  0x33   : > { %p3235_p2 = pnand %p3234_p4, %p3228_p13 }
  0x35   : > { %3238 = shalt.err (!%p3235_p2)
}
  0x36   : > { %s3239_s16 = scalar_lea.vmem %s3551_s4, 4096  ;;  %s3399_s17 = smov [#allocation5]  }
  0x37   : > { %p3240_p6 = scmp.ne.s32.totalorder %s3551_s4, %s3239_s16  ;;  %s3244_s7 = sshll.u32 %s3399_s17, 4  ;;  %s3245_s7 = int_to_ptr.vmem [resolvable:$false] %s3244_s7 }
  0x38   : > { %s3246_s20 = scalar_lea.vmem %s3245_s7, 8192  ;;  %p3247_p10 = scmp.lt.s32.totalorder %s3551_s4, %s3245_s7 }
  0x39   : > { %p3242_p11 = pnand %p3240_p6, %p3226_p9  ;;  %p3248_p0 = scmp.lt.s32.totalorder %s3246_s20, %s3239_s16 }
  0x3b   : > { %p3243_p12 = pneg %p3242_p11  ;;  %p3249_p7 = por %p3248_p0, %p3247_p10 }
  0x3d   : > { %p3250_p5 = pnand %p3249_p7, %p3243_p12 }
  0x3f   : > { %3253 = shalt.err (!%p3250_p5)
}
  0x40   : > { %s4877_s18 = smov 512   ;;  %s4878_s19 = smov 32  }
  0x41   : > { %3068 = dma.hbm_to_vmem [thread:$0]  (!%p3557_p3), %s3549_s21, 4096, %s3551_s4, %s3562_s9, %s4877_s18, %s4877_s18, %s4878_s19  }
  0x42   : > { %p184_p10 = scmp.lt.s32.totalorder %s3396_s29, 3  ;;  %p4890_p12 = scmp.ge.s32.totalorder %s3396_s29, 1 }
  0x43   : > { %s70_s16 = ssub.s32 %s3511_s10, %s3523_s12  ;;  %s75_s17 = sadd.s32 1, %s3372_s24 }
  0x44   : > { %p3596_p1 = pnand %p4890_p12, %p184_p10  ;;  %p73_p2 = scmp.eq.s32.totalorder %s70_s16, 0 }
  0x45   : > { %p82_p4 = scmp.ne.s32.totalorder %s3372_s24, %s3368_s23  ;;  %p88_p9 = scmp.ne.s32.totalorder %s3368_s23, %s3364_s22 }
  0x46   : > { %s161_s7 = sand.u32 1, %s3372_s24   ;;  %p4892_p13 = scmp.eq.s32.totalorder %s3396_s29, 0 }
  0x47   : > { %s3609_s6 = scalar_select %p73_p2, %s3372_s24, %s75_s17  }
  0x48   : > { %p84_p6 = por %p82_p4, %p4892_p13  ;;  %p3615_p3 = por %p88_p9, %p3504_p8 }
  0x49   : > { %s3010_s4 = sshll.u32 %s161_s7, 6  ;;  %p4894_p11 = scmp.lt.s32.totalorder %s3396_s29, 2 }
  0x4a   : > { %s4893_s21 = scalar_select %p3615_p3, 1, 0 }
  0x4b   : > { %p3621_p0 = pnand %p4894_p11, %p84_p6  ;;  %p4896_p7 = pmov %p4894_p11 }
  0x4c   : > { %s3058_s10 = scalar_select %p84_p6, [#allocation4], [#allocation11] }
  0x4d   : > { %s3059_s22 = scalar_select %p84_p6, %s3392_s28, 0 }
  0x4e   : > { %s4917_s10 = smov (!%p4896_p7, %s3058_s10), [#allocation12]  ;;  %p4897_p5 = pmov %p4896_p7 }
  0x4f   : > { %s165_s8 = scalar_lea.vmem [#allocation8], %s3010_s4  ;;  %s3637_s1 = scalar_lea.sflag [#allocation9], %s161_s7 }
  0x50   : > { %s4919_s22 = smov (!%p4897_p5, %s3059_s22), 0  ;;  %s176_s20 = sshll.u32 %s165_s8, 4  ;;  %s3630_s20 = int_to_ptr.vmem [resolvable:$true] %s176_s20 }
  0x51   : > { %s166_s12 = sld [smem:[%s4917_s10 + %s4919_s22]]  ;;  %p3256_p10 = pneg %p3621_p0 }
  0x52   : > { %s3259_s18 = scalar_lea.hbm %s4871_s2, 2048 }
  0x57   : > { %s3031_s16 = sshll.u32 %s166_s12, 10 }
  0x58   : > { %s3635_s19 = scalar_lea.hbm %s4871_s2, %s3031_s16 }
  0x59   : > { %s3254_s5 = scalar_lea.hbm %s3635_s19, 1024  ;;  %p3260_p4 = scmp.lt.u32.totalorder %s3635_s19, %s4871_s2 }
  0x5a   : > { %p3255_p8 = scmp.ne.s32.totalorder %s3635_s19, %s3254_s5  ;;  %p3261_p9 = scmp.lt.u32.totalorder %s3259_s18, %s3254_s5 }
  0x5b   : > { %p3263_p6 = scmp.lt.u32.totalorder %s3254_s5, %s3635_s19 }
  0x5c   : > { %p3257_p12 = pnand %p3256_p10, %p3255_p8  ;;  %p3262_p13 = por %p3261_p9, %p3260_p4 }
  0x5e   : > { %p3258_p2 = pneg %p3257_p12  ;;  %p3264_p11 = por %p3263_p6, %p3262_p13 }
  0x60   : > { %p3265_p7 = pnand %p3264_p11, %p3258_p2 }
  0x62   : > { %3268 = shalt.err (!%p3265_p7)
}
  0x63   : > { %s3269_s7 = scalar_lea.vmem %s3630_s20, 1024  ;;  %s3402_s8 = smov [#allocation8]  }
  0x64   : > { %p3270_p5 = scmp.ne.s32.totalorder %s3630_s20, %s3269_s7  ;;  %s3274_s16 = sshll.u32 %s3402_s8, 4  ;;  %s3275_s16 = int_to_ptr.vmem [resolvable:$false] %s3274_s16 }
  0x65   : > { %s3276_s17 = scalar_lea.vmem %s3275_s16, 2048  ;;  %p3277_p3 = scmp.lt.s32.totalorder %s3630_s20, %s3275_s16 }
  0x66   : > { %p3272_p8 = pnand %p3270_p5, %p3256_p10  ;;  %p3278_p4 = scmp.lt.s32.totalorder %s3276_s17, %s3269_s7 }
  0x68   : > { %p3273_p12 = pneg %p3272_p8  ;;  %p3279_p9 = por %p3278_p4, %p3277_p3 }
  0x6a   : > { %p3280_p13 = pnand %p3279_p9, %p3273_p12 }
  0x6c   : > { %3283 = shalt.err (!%p3280_p13)
}
  0x6d   : > { %s4898_s5 = smov 32   ;;  %s4899_s4 = smov 512  }
  0x6e   : > { %3073 = dma.hbm_to_vmem [thread:$0]  (!%p3621_p0), %s3635_s19, 1024, %s3630_s20, %s3637_s1, %s4899_s4, %s4899_s4, %s4898_s5  }
  0x6f   : > { %188 = sbr.rel (%p3596_p1) target bundleno = 632 (0x278), region = 28  ;;  %s3671_s10 = sand.u32 (!%p3596_p1), 1, %s3380_s26  }
  0x70   : > { %s3014_s18 = sshll.u32 (!%p3596_p1), %s3671_s10, 8  ;;  %s191_s22 = scalar_lea.sflag (!%p3596_p1), [#allocation6], %s3671_s10 }
  0x71   : > { %s3675_s12 = scalar_lea.vmem (!%p3596_p1), [#allocation5], %s3014_s18  ;;  %p4900_p3 = scmp.ne.s32.totalorder (!%p3596_p1), %s4885_s11, 0 }
  0x76   : > { %3351 = dma.done.wait (%p4900_p3), %s191_s22, 4096  }
  0x77   : > { %3353 = vsyncadd (%p4900_p3), %s191_s22, 4294963200  ;;  %s199_s1 = sand.u32 1, %s3368_s23   ;;  %p4901_p1 = scmp.ne.s32.totalorder %s4893_s21, 0 }
  0x78   : > { %s3015_s19 = sshll.u32 %s199_s1, 6  ;;  %s200_s30 = scalar_lea.sflag [#allocation9], %s199_s1 }
  0x79   : > { %s3682_s9 = scalar_lea.vmem [#allocation8], %s3015_s19 }
  0x7a   : > { %3355 = dma.done.wait (%p4901_p1), %s200_s30, 1024  }
  0x7b   : > { %3357 = vsyncadd (%p4901_p1), %s200_s30, 4294966272  ;;  %v291_v0 = vlaneseq  ;;  %v3403_v1 = vmov 1966171168   ;;  %v3158_v6 = vld [vmem:[%s3675_s12] ss:$8 sps:$4 sm:$0xff]   ;;  %v3713_v22 = vld [vmem:[%s3675_s12 + $0x98] sm:$0xff] }
  0x7c   : > { %v289_v2 = vunpack.c.l.s4 %v3403_v1  ;;  %v3160_v7 = vld [vmem:[%s3675_s12 + $0x4] ss:$8 sps:$4 sm:$0xff]   ;;  %v3161_v8 = vld [vmem:[%s3675_s12 + $0x10] ss:$8 sps:$4 sm:$0xff]   ;;  %v3163_v9 = vld [vmem:[%s3675_s12 + $0x14] ss:$8 sps:$4 sm:$0xff]  }
  0x7d   : > { %v292_v4 = vshrl.u32 %v291_v0, 7  ;;  %v3707_v20 = vld [vmem:[%s3675_s12 + $0x88] sm:$0xff]  ;;  %v3716_v23 = vld [vmem:[%s3675_s12 + $0xb8] sm:$0xff]  ;;  %v3722_v27 = vld [vmem:[%s3675_s12 + $0x80] sm:$0xff]  ;;  %s3016_s11 = sshll.u32 %s3671_s10, 6  ;;  %s3032_s7 = sshll.u32 %s3388_s27, 10 }
  0x7e   : > { %v290_v3 = vunpack.c.0.s8 %v289_v2  ;;  %v3710_v21 = vld [vmem:[%s3675_s12 + $0xa8] sm:$0xff]  ;;  %v3725_v28 = vld [vmem:[%s3675_s12 + $0xa0] sm:$0xff]  ;;  %v3728_v29 = vld [vmem:[%s3675_s12 + $0x90] sm:$0xff]  ;;  %s228_s21 = scalar_lea.vmem [#allocation10], %s3016_s11  ;;  %s4811_s17 = scalar_lea.hbm %s4872_s3, %s3032_s7 }
  0x7f   : > { %v3697_v13 = vsub.s32 1, %v292_v4  ;;  %v3699_v14 = vsub.s32 3, %v292_v4  ;;  %v3702_v17 = vsub.s32 0, %v292_v4  ;;  %v3704_v18 = vsub.s32 2, %v292_v4  ;;  %v3731_v30 = vld [vmem:[%s3675_s12 + $0xb0] sm:$0xff]  ;;  %v2220_v32 = vld [vmem:[%s3682_s9] sm:$0xff] }
  0x80   : > { %v3688_v5 = vsub.s32 %v290_v3, %v292_v4  ;;  %v2224_v33 = vld [vmem:[%s3682_s9 + $0x20] sm:$0xff]  ;;  %v3739_v34 = vld [vmem:[%s3675_s12 + $0xc8] sm:$0xff]  ;;  %v3761_v44 = vld [vmem:[%s3675_s12 + $0xd8] sm:$0xff]  ;;  %s2893_s20 = sshll.u32 %s228_s21, 4  ;;  %s2877_s27 = scalar_lea.sflag [#allocation7], %s3671_s10  ;;  %s4806_s20 = int_to_ptr.vmem [resolvable:$true] %s2893_s20 }
  0x81   : > { %v3747_v37 = vcombine.low %v2220_v32, %v2224_v33  ;;  %v3018_v38 = vcombine.high %v2220_v32, %v2224_v33  ;;  %v3758_v43 = vld [vmem:[%s3675_s12 + $0xe8] sm:$0xff]  ;;  %v3764_v45 = vld [vmem:[%s3675_s12 + $0xf8] sm:$0xff]  ;;  %v3767_v46 = vld [vmem:[%s3675_s12 + $0xc0] sm:$0xff]  ;;  %s3284_s5 = scalar_lea.vmem %s4806_s20, 1024  ;;  %p4902_p10 = scmp.ne.s32.totalorder %s4886_s14, 0 }
  0x82   : > { %v294_v10 = vrot.slane %v3158_v6, %v3688_v5  ;;  %v308_v11 = vrot.slane %v3161_v8, %v3688_v5  ;;  %v301_v12 = vrot.slane %v3160_v7, %v3688_v5  ;;  %v315_v15 = vrot.slane %v3163_v9, %v3688_v5  ;;  %v3782_v55 = vld [vmem:[%s3675_s12 + $0xe0] sm:$0xff]  ;;  %v3789_v60 = vld [vmem:[%s3675_s12 + $0xd0] sm:$0xff]  ;;  %p3285_p0 = scmp.ne.s32.totalorder %s4806_s20, %s3284_s5  ;;  %s3404_s4 = smov [#allocation10]  }
  0x83   : > { %2556 = vmatprep.mubr.bf16.mxu0 %v3018_v38  ;;  %2728 = vmatprep.mubr.bf16.mxu1 %v3018_v38  ;;  %v3794_v1 = vld [vmem:[%s3675_s12 + $0xf0] sm:$0xff]  ;;  %s3288_s18 = sshll.u32 %s3404_s4, 4  ;;  %s3289_s18 = int_to_ptr.vmem [resolvable:$false] %s3288_s18 }
  0x84   : > { %v316_v16 = vcombine.low %v294_v10, %v308_v11  ;;  %v317_v19 = vcombine.high %v294_v10, %v308_v11  ;;  %v318_v24 = vcombine.low %v301_v12, %v315_v15  ;;  %v319_v25 = vcombine.high %v301_v12, %v315_v15  ;;  %p3286_p2 = pnand %p3285_p0, %p4902_p10  ;;  %s3290_s22 = scalar_lea.vmem %s3289_s18, 2048 }
  0x85   : > { %p3291_p11 = scmp.lt.s32.totalorder %s4806_s20, %s3289_s18  ;;  %p3292_p7 = scmp.lt.s32.totalorder %s3290_s22, %s3284_s5 }
  0x86   : > { %v3719_v26 = vrot.slane %v316_v16, %v3688_v5  ;;  %v3734_v31 = vrot.slane %v317_v19, %v3688_v5  ;;  %v3742_v35 = vrot.slane %v318_v24, %v3688_v5  ;;  %v3745_v36 = vrot.slane %v319_v25, %v3688_v5  ;;  %p3287_p6 = pneg %p3286_p2 }
  0x87   : > { %p3293_p5 = por %p3292_p7, %p3291_p11 }
  0x88   : > { %v563_v39 = vrot.slane %v3719_v26, %v3697_v13  ;;  %v571_v40 = vrot.slane %v3719_v26, %v3699_v14  ;;  %v559_v41 = vrot.slane %v3719_v26, %v3702_v17  ;;  %v567_v42 = vrot.slane %v3719_v26, %v3704_v18 }
  0x89   : > { %v579_v47 = vrot.slane %v3734_v31, %v3697_v13  ;;  %v587_v48 = vrot.slane %v3734_v31, %v3699_v14  ;;  %v575_v49 = vrot.slane %v3734_v31, %v3702_v17  ;;  %v583_v50 = vrot.slane %v3734_v31, %v3704_v18  ;;  %p3294_p8 = pnand %p3293_p5, %p3287_p6 }
  0x8a   : > { %v1197_v51 = vmul.f32 %v563_v39, %v3707_v20  ;;  %v1201_v52 = vmul.f32 %v563_v39, %v3710_v21  ;;  %v1199_v53 = vmul.f32 %v571_v40, %v3713_v22  ;;  %v1203_v54 = vmul.f32 %v571_v40, %v3716_v23 }
  0x8b   : > { %v1196_v56 = vmul.f32 %v559_v41, %v3722_v27  ;;  %v1200_v57 = vmul.f32 %v559_v41, %v3725_v28  ;;  %v1198_v58 = vmul.f32 %v567_v42, %v3728_v29  ;;  %v1202_v59 = vmul.f32 %v567_v42, %v3731_v30 }
  0x8c   : > { %v1709_v61 = vpack.c.bf16 %v1201_v52, %v1197_v51  ;;  %v1711_v62 = vpack.c.bf16 %v1203_v54, %v1199_v53  ;;  %v1205_v63 = vmul.f32 %v563_v39, %v3739_v34  ;;  %v1209_v0 = vmul.f32 %v563_v39, %v3758_v43 }
  0x8d   : > { %v1708_v2 = vpack.c.bf16 %v1200_v57, %v1196_v56  ;;  %v1710_v3 = vpack.c.bf16 %v1202_v59, %v1198_v58  ;;  %v1207_v4 = vmul.f32 %v571_v40, %v3761_v44  ;;  %v1211_v6 = vmul.f32 %v571_v40, %v3764_v45 }
  0x8e   : > { %2524 = vmatprep.subr.bf16.mxu0 %v1709_v61  ;;  %2696 = vmatprep.subr.bf16.mxu1 %v1711_v62  ;;  %v1713_v7 = vpack.c.bf16 %v1209_v0, %v1205_v63  ;;  %v1204_v8 = vmul.f32 %v559_v41, %v3767_v46  ;;  %v1208_v9 = vmul.f32 %v559_v41, %v3782_v55 }
  0x8f   : > { %2525 = vmatpush1.bf16.msra.mxu0 %v1708_v2  ;;  %2697 = vmatpush1.bf16.msra.mxu1 %v1710_v3  ;;  %v1715_v10 = vpack.c.bf16 %v1211_v6, %v1207_v4  ;;  %v1206_v11 = vmul.f32 %v567_v42, %v3789_v60  ;;  %v1210_v12 = vmul.f32 %v567_v42, %v3794_v1 }
  0x90   : > { %2526 = vmatprep.subr.bf16.mxu0 %v1713_v7  ;;  %v1712_v15 = vpack.c.bf16 %v1208_v9, %v1204_v8  ;;  %v1213_v16 = vmul.f32 %v579_v47, %v3707_v20  ;;  %v1217_v19 = vmul.f32 %v579_v47, %v3710_v21  ;;  %v1215_v24 = vmul.f32 %v587_v48, %v3713_v22 }
  0x91   : > { %2698 = vmatprep.subr.bf16.mxu1 %v1715_v10  ;;  %v1714_v25 = vpack.c.bf16 %v1210_v12, %v1206_v11  ;;  %v1219_v32 = vmul.f32 %v587_v48, %v3716_v23  ;;  %v1212_v33 = vmul.f32 %v575_v49, %v3722_v27  ;;  %v1216_v38 = vmul.f32 %v575_v49, %v3725_v28 }
  0x92   : > { %v1717_v39 = vpack.c.bf16 %v1217_v19, %v1213_v16  ;;  %v1214_v40 = vmul.f32 %v583_v50, %v3728_v29  ;;  %v1218_v41 = vmul.f32 %v583_v50, %v3731_v30  ;;  %v1221_v42 = vmul.f32 %v579_v47, %v3739_v34 }
  0x93   : > { %2527 = vmatpush1.bf16.msra.mxu0 %v1712_v15  ;;  %2699 = vmatpush1.bf16.msra.mxu1 %v1714_v25  ;;  %v1719_v51 = vpack.c.bf16 %v1219_v32, %v1215_v24  ;;  %v1716_v52 = vpack.c.bf16 %v1216_v38, %v1212_v33  ;;  %v1225_v53 = vmul.f32 %v579_v47, %v3758_v43 }
  0x94   : > { %2528 = vmatprep.subr.bf16.mxu0 %v1717_v39  ;;  %v1718_v54 = vpack.c.bf16 %v1218_v41, %v1214_v40  ;;  %v1223_v56 = vmul.f32 %v587_v48, %v3761_v44  ;;  %v1227_v57 = vmul.f32 %v587_v48, %v3764_v45  ;;  %v1220_v58 = vmul.f32 %v575_v49, %v3767_v46 }
  0x95   : > { %2700 = vmatprep.subr.bf16.mxu1 %v1719_v51  ;;  %v1721_v59 = vpack.c.bf16 %v1225_v53, %v1221_v42  ;;  %v1224_v61 = vmul.f32 %v575_v49, %v3782_v55  ;;  %v1222_v62 = vmul.f32 %v583_v50, %v3789_v60  ;;  %v1226_v63 = vmul.f32 %v583_v50, %v3794_v1 }
  0x96   : > { %v1723_v0 = vpack.c.bf16 %v1227_v57, %v1223_v56  ;;  %v348_v47 = vcombine.high %v3719_v26, %v3719_v26  ;;  %v350_v2 = vcombine.high %v3734_v31, %v3734_v31  ;;  %v3824_v48 = vrot.slane %v3742_v35, %v3697_v13 }
  0x97   : > { %2529 = vmatpush1.bf16.msra.mxu0 %v1716_v52  ;;  %2701 = vmatpush1.bf16.msra.mxu1 %v1718_v54  ;;  %v1720_v3 = vpack.c.bf16 %v1224_v61, %v1220_v58  ;;  %v1722_v4 = vpack.c.bf16 %v1226_v63, %v1222_v62  ;;  %v3828_v49 = vrot.slane %v3742_v35, %v3699_v14 }
  0x98   : > { %2530 = vmatprep.subr.bf16.mxu0 %v1721_v59  ;;  %2702 = vmatprep.subr.bf16.mxu1 %v1723_v0  ;;  %v595_v50 = vrot.slane %v348_v47, %v3697_v13  ;;  %v603_v26 = vrot.slane %v348_v47, %v3699_v14  ;;  %v591_v31 = vrot.slane %v348_v47, %v3702_v17 }
  0x99   : > { %v599_v6 = vrot.slane %v348_v47, %v3704_v18  ;;  %v611_v7 = vrot.slane %v350_v2, %v3697_v13  ;;  %v619_v8 = vrot.slane %v350_v2, %v3699_v14  ;;  %v607_v9 = vrot.slane %v350_v2, %v3702_v17 }
  0x9a   : > { %v1229_v10 = vmul.f32 %v595_v50, %v3707_v20  ;;  %v1233_v11 = vmul.f32 %v595_v50, %v3710_v21  ;;  %v1231_v12 = vmul.f32 %v603_v26, %v3713_v22  ;;  %v1235_v15 = vmul.f32 %v603_v26, %v3716_v23 }
  0x9b   : > { %2531 = vmatpush1.bf16.msra.mxu0 %v1720_v3  ;;  %2703 = vmatpush1.bf16.msra.mxu1 %v1722_v4  ;;  %v1228_v16 = vmul.f32 %v591_v31, %v3722_v27  ;;  %v1232_v19 = vmul.f32 %v591_v31, %v3725_v28  ;;  %v1230_v24 = vmul.f32 %v599_v6, %v3728_v29 }
  0x9c   : > { %v1725_v25 = vpack.c.bf16 %v1233_v11, %v1229_v10  ;;  %v1727_v32 = vpack.c.bf16 %v1235_v15, %v1231_v12  ;;  %v1234_v33 = vmul.f32 %v599_v6, %v3731_v30  ;;  %v1237_v38 = vmul.f32 %v595_v50, %v3739_v34 }
  0x9d   : > { %v1724_v39 = vpack.c.bf16 %v1232_v19, %v1228_v16  ;;  %v1241_v40 = vmul.f32 %v595_v50, %v3758_v43  ;;  %v1239_v41 = vmul.f32 %v603_v26, %v3761_v44  ;;  %v1243_v42 = vmul.f32 %v603_v26, %v3764_v45 }
  0x9e   : > { %2532 = vmatprep.subr.bf16.mxu0 %v1725_v25  ;;  %2704 = vmatprep.subr.bf16.mxu1 %v1727_v32  ;;  %v1726_v51 = vpack.c.bf16 %v1234_v33, %v1230_v24  ;;  %v1236_v52 = vmul.f32 %v591_v31, %v3767_v46  ;;  %v1240_v53 = vmul.f32 %v591_v31, %v3782_v55 }
  0x9f   : > { %2533 = vmatpush1.bf16.msra.mxu0 %v1724_v39  ;;  %v1729_v54 = vpack.c.bf16 %v1241_v40, %v1237_v38  ;;  %v1731_v56 = vpack.c.bf16 %v1243_v42, %v1239_v41  ;;  %v1238_v57 = vmul.f32 %v599_v6, %v3789_v60  ;;  %v1242_v58 = vmul.f32 %v599_v6, %v3794_v1 }
  0xa0   : > { %2705 = vmatpush1.bf16.msra.mxu1 %v1726_v51  ;;  %v1728_v59 = vpack.c.bf16 %v1240_v53, %v1236_v52  ;;  %v1245_v61 = vmul.f32 %v611_v7, %v3707_v20  ;;  %v1249_v62 = vmul.f32 %v611_v7, %v3710_v21  ;;  %v1247_v63 = vmul.f32 %v619_v8, %v3713_v22 }
  0xa1   : > { %2534 = vmatprep.subr.bf16.mxu0 %v1729_v54  ;;  %2706 = vmatprep.subr.bf16.mxu1 %v1731_v56  ;;  %v1730_v0 = vpack.c.bf16 %v1242_v58, %v1238_v57  ;;  %v1251_v47 = vmul.f32 %v619_v8, %v3716_v23  ;;  %v1244_v3 = vmul.f32 %v607_v9, %v3722_v27 }
  0xa2   : > { %v1733_v4 = vpack.c.bf16 %v1249_v62, %v1245_v61  ;;  %v1248_v50 = vmul.f32 %v607_v9, %v3725_v28  ;;  %v615_v26 = vrot.slane %v350_v2, %v3704_v18  ;;  %v1253_v31 = vmul.f32 %v611_v7, %v3739_v34 }
  0xa3   : > { %2535 = vmatpush1.bf16.msra.mxu0 %v1728_v59  ;;  %v1735_v6 = vpack.c.bf16 %v1251_v47, %v1247_v63  ;;  %v1257_v10 = vmul.f32 %v611_v7, %v3758_v43  ;;  %v1255_v11 = vmul.f32 %v619_v8, %v3761_v44  ;;  %v1259_v12 = vmul.f32 %v619_v8, %v3764_v45 }
  0xa4   : > { %2707 = vmatpush1.bf16.msra.mxu1 %v1730_v0  ;;  %2536 = vmatprep.subr.bf16.mxu0 %v1733_v4  ;;  %v1732_v15 = vpack.c.bf16 %v1248_v50, %v1244_v3  ;;  %v1246_v16 = vmul.f32 %v615_v26, %v3728_v29  ;;  %v1250_v19 = vmul.f32 %v615_v26, %v3731_v30 }
  0xa5   : > { %2708 = vmatprep.subr.bf16.mxu1 %v1735_v6  ;;  %v1737_v24 = vpack.c.bf16 %v1257_v10, %v1253_v31  ;;  %v1739_v2 = vpack.c.bf16 %v1259_v12, %v1255_v11  ;;  %v1252_v25 = vmul.f32 %v607_v9, %v3767_v46  ;;  %v1256_v32 = vmul.f32 %v607_v9, %v3782_v55 }
  0xa6   : > { %v1734_v33 = vpack.c.bf16 %v1250_v19, %v1246_v16  ;;  %v1254_v7 = vmul.f32 %v615_v26, %v3789_v60  ;;  %v1258_v38 = vmul.f32 %v615_v26, %v3794_v1  ;;  %v1261_v8 = vmul.f32 %v3824_v48, %v3707_v20 }
  0xa7   : > { %2537 = vmatpush1.bf16.msra.mxu0 %v1732_v15  ;;  %v1736_v39 = vpack.c.bf16 %v1256_v32, %v1252_v25  ;;  %v1265_v40 = vmul.f32 %v3824_v48, %v3710_v21  ;;  %v1263_v41 = vmul.f32 %v3828_v49, %v3713_v22  ;;  %v1267_v42 = vmul.f32 %v3828_v49, %v3716_v23 }
  0xa8   : > { %2709 = vmatpush1.bf16.msra.mxu1 %v1734_v33  ;;  %2538 = vmatprep.subr.bf16.mxu0 %v1737_v24  ;;  %v1738_v9 = vpack.c.bf16 %v1258_v38, %v1254_v7  ;;  %v623_v51 = vrot.slane %v3742_v35, %v3702_v17  ;;  %v631_v52 = vrot.slane %v3742_v35, %v3704_v18 }
  0xa9   : > { %2710 = vmatprep.subr.bf16.mxu1 %v1739_v2  ;;  %v1741_v53 = vpack.c.bf16 %v1265_v40, %v1261_v8  ;;  %v1743_v54 = vpack.c.bf16 %v1267_v42, %v1263_v41  ;;  %v1269_v56 = vmul.f32 %v3824_v48, %v3739_v34  ;;  %v1273_v57 = vmul.f32 %v3824_v48, %v3758_v43  ;;  %v3164_v40 = vld [vmem:[%s3675_s12 + $0x20] ss:$8 sps:$4 sm:$0xff]  }
  0xaa   : > { %v1260_v58 = vmul.f32 %v623_v51, %v3722_v27  ;;  %v1264_v59 = vmul.f32 %v623_v51, %v3725_v28  ;;  %v1262_v61 = vmul.f32 %v631_v52, %v3728_v29  ;;  %v1266_v62 = vmul.f32 %v631_v52, %v3731_v30 }
  0xab   : > { %2539 = vmatpush1.bf16.msra.mxu0 %v1736_v39  ;;  %v1745_v63 = vpack.c.bf16 %v1273_v57, %v1269_v56  ;;  %v1271_v0 = vmul.f32 %v3828_v49, %v3761_v44  ;;  %v1275_v47 = vmul.f32 %v3828_v49, %v3764_v45  ;;  %v1268_v3 = vmul.f32 %v623_v51, %v3767_v46 }
  0xac   : > { %2711 = vmatpush1.bf16.msra.mxu1 %v1738_v9  ;;  %2540 = vmatprep.subr.bf16.mxu0 %v1741_v53  ;;  %v1740_v48 = vpack.c.bf16 %v1264_v59, %v1260_v58  ;;  %v1742_v4 = vpack.c.bf16 %v1266_v62, %v1262_v61  ;;  %v1272_v50 = vmul.f32 %v623_v51, %v3782_v55  ;;  %v3168_v53 = vld [vmem:[%s3675_s12 + $0x24] ss:$8 sps:$4 sm:$0xff]  }
  0xad   : > { %2712 = vmatprep.subr.bf16.mxu1 %v1743_v54  ;;  %v1747_v26 = vpack.c.bf16 %v1275_v47, %v1271_v0  ;;  %v1270_v31 = vmul.f32 %v631_v52, %v3789_v60  ;;  %v1274_v6 = vmul.f32 %v631_v52, %v3794_v1  ;;  %v643_v10 = vrot.slane %v3745_v36, %v3697_v13  ;;  %v3166_v52 = vld [vmem:[%s3675_s12 + $0x30] ss:$8 sps:$4 sm:$0xff]   ;;  %v3169_v54 = vld [vmem:[%s3675_s12 + $0x34] ss:$8 sps:$4 sm:$0xff]  }
  0xae   : > { %v1744_v11 = vpack.c.bf16 %v1272_v50, %v1268_v3  ;;  %v651_v49 = vrot.slane %v3745_v36, %v3699_v14  ;;  %v639_v12 = vrot.slane %v3745_v36, %v3702_v17  ;;  %v647_v15 = vrot.slane %v3745_v36, %v3704_v18 }
  0xaf   : > { %2541 = vmatpush1.bf16.msra.mxu0 %v1740_v48  ;;  %v1746_v16 = vpack.c.bf16 %v1274_v6, %v1270_v31  ;;  %v1277_v19 = vmul.f32 %v643_v10, %v3707_v20  ;;  %v1281_v24 = vmul.f32 %v643_v10, %v3710_v21  ;;  %v1285_v2 = vmul.f32 %v643_v10, %v3739_v34 }
  0xb0   : > { %2713 = vmatpush1.bf16.msra.mxu1 %v1742_v4  ;;  %2542 = vmatprep.subr.bf16.mxu0 %v1745_v63  ;;  %v1279_v25 = vmul.f32 %v651_v49, %v3713_v22  ;;  %v1283_v32 = vmul.f32 %v651_v49, %v3716_v23  ;;  %v1276_v33 = vmul.f32 %v639_v12, %v3722_v27 }
  0xb1   : > { %2714 = vmatprep.subr.bf16.mxu1 %v1747_v26  ;;  %v1749_v7 = vpack.c.bf16 %v1281_v24, %v1277_v19  ;;  %v1280_v38 = vmul.f32 %v639_v12, %v3725_v28  ;;  %v1278_v8 = vmul.f32 %v647_v15, %v3728_v29  ;;  %v1282_v39 = vmul.f32 %v647_v15, %v3731_v30 }
  0xb2   : > { %v1751_v41 = vpack.c.bf16 %v1283_v32, %v1279_v25  ;;  %v1289_v42 = vmul.f32 %v643_v10, %v3758_v43  ;;  %v1287_v9 = vmul.f32 %v651_v49, %v3761_v44  ;;  %v1291_v51 = vmul.f32 %v651_v49, %v3764_v45 }
  0xb3   : > { %2543 = vmatpush1.bf16.msra.mxu0 %v1744_v11  ;;  %v1748_v56 = vpack.c.bf16 %v1280_v38, %v1276_v33  ;;  %v1750_v57 = vpack.c.bf16 %v1282_v39, %v1278_v8  ;;  %v1284_v58 = vmul.f32 %v639_v12, %v3767_v46  ;;  %v1288_v59 = vmul.f32 %v639_v12, %v3782_v55 }
  0xb4   : > { %2715 = vmatpush1.bf16.msra.mxu1 %v1746_v16  ;;  %2544 = vmatprep.subr.bf16.mxu0 %v1749_v7  ;;  %v1753_v61 = vpack.c.bf16 %v1289_v42, %v1285_v2  ;;  %v1755_v62 = vpack.c.bf16 %v1291_v51, %v1287_v9  ;;  %v1286_v63 = vmul.f32 %v647_v15, %v3789_v60 }
  0xb5   : > { %2716 = vmatprep.subr.bf16.mxu1 %v1751_v41  ;;  %v1752_v0 = vpack.c.bf16 %v1288_v59, %v1284_v58  ;;  %v1290_v47 = vmul.f32 %v647_v15, %v3794_v1  ;;  %v349_v3 = vcombine.high %v3742_v35, %v3742_v35  ;;  %v351_v48 = vcombine.high %v3745_v36, %v3745_v36 }
  0xb6   : > { %v3931_v4 = vrot.slane %v3164_v40, %v3688_v5  ;;  %v3934_v50 = vrot.slane %v3166_v52, %v3688_v5  ;;  %v3937_v26 = vrot.slane %v3168_v53, %v3688_v5  ;;  %v3940_v31 = vrot.slane %v3169_v54, %v3688_v5 }
  0xb7   : > { %2545 = vmatpush1.bf16.msra.mxu0 %v1748_v56  ;;  %v1754_v6 = vpack.c.bf16 %v1290_v47, %v1286_v63  ;;  %v659_v10 = vrot.slane %v349_v3, %v3697_v13  ;;  %v667_v35 = vrot.slane %v349_v3, %v3699_v14  ;;  %v655_v36 = vrot.slane %v349_v3, %v3702_v17 }
  0xb8   : > { %2717 = vmatpush1.bf16.msra.mxu1 %v1750_v57  ;;  %2546 = vmatprep.subr.bf16.mxu0 %v1753_v61  ;;  %v663_v11 = vrot.slane %v349_v3, %v3704_v18  ;;  %v675_v49 = vrot.slane %v351_v48, %v3697_v13  ;;  %v683_v12 = vrot.slane %v351_v48, %v3699_v14 }
  0xb9   : > { %2718 = vmatprep.subr.bf16.mxu1 %v1755_v62  ;;  %v1293_v15 = vmul.f32 %v659_v10, %v3707_v20  ;;  %v1297_v16 = vmul.f32 %v659_v10, %v3710_v21  ;;  %v1295_v19 = vmul.f32 %v667_v35, %v3713_v22  ;;  %v1299_v24 = vmul.f32 %v667_v35, %v3716_v23 }
  0xba   : > { %v1292_v2 = vmul.f32 %v655_v36, %v3722_v27  ;;  %v1296_v25 = vmul.f32 %v655_v36, %v3725_v28  ;;  %v1294_v32 = vmul.f32 %v663_v11, %v3728_v29  ;;  %v1298_v33 = vmul.f32 %v663_v11, %v3731_v30 }
  0xbb   : > { %2547 = vmatpush1.bf16.msra.mxu0 %v1752_v0  ;;  %v1757_v7 = vpack.c.bf16 %v1297_v16, %v1293_v15  ;;  %v1759_v38 = vpack.c.bf16 %v1299_v24, %v1295_v19  ;;  %v1301_v8 = vmul.f32 %v659_v10, %v3739_v34  ;;  %v1305_v39 = vmul.f32 %v659_v10, %v3758_v43 }
  0xbc   : > { %2719 = vmatpush1.bf16.msra.mxu1 %v1754_v6  ;;  %v1756_v40 = vpack.c.bf16 %v1296_v25, %v1292_v2  ;;  %v1758_v41 = vpack.c.bf16 %v1298_v33, %v1294_v32  ;;  %v1303_v42 = vmul.f32 %v667_v35, %v3761_v44  ;;  %v1307_v9 = vmul.f32 %v667_v35, %v3764_v45 }
  0xbd   : > { %2548 = vmatprep.subr.bf16.mxu0 %v1757_v7  ;;  %2720 = vmatprep.subr.bf16.mxu1 %v1759_v38  ;;  %v1761_v51 = vpack.c.bf16 %v1305_v39, %v1301_v8  ;;  %v1300_v52 = vmul.f32 %v655_v36, %v3767_v46  ;;  %v1304_v53 = vmul.f32 %v655_v36, %v3782_v55  ;;  %v3981_v7 = vld [vmem:[%s3682_s9 + $0x8] sm:$0xff] }
  0xbe   : > { %v1763_v54 = vpack.c.bf16 %v1307_v9, %v1303_v42  ;;  %v1302_v56 = vmul.f32 %v663_v11, %v3789_v60  ;;  %v1306_v57 = vmul.f32 %v663_v11, %v3794_v1  ;;  %v1309_v58 = vmul.f32 %v675_v49, %v3707_v20  ;;  %v3984_v38 = vld [vmem:[%s3682_s9 + $0x28] sm:$0xff] }
  0xbf   : > { %2549 = vmatpush1.bf16.msra.mxu0 %v1756_v40  ;;  %v1760_v59 = vpack.c.bf16 %v1304_v53, %v1300_v52  ;;  %v1313_v61 = vmul.f32 %v675_v49, %v3710_v21  ;;  %v1311_v62 = vmul.f32 %v683_v12, %v3713_v22  ;;  %v1315_v63 = vmul.f32 %v683_v12, %v3716_v23 }
  0xc0   : > { %2721 = vmatpush1.bf16.msra.mxu1 %v1758_v41  ;;  %2550 = vmatprep.subr.bf16.mxu0 %v1761_v51  ;;  %v1762_v0 = vpack.c.bf16 %v1306_v57, %v1302_v56  ;;  %v671_v47 = vrot.slane %v351_v48, %v3702_v17  ;;  %v679_v3 = vrot.slane %v351_v48, %v3704_v18 }
  0xc1   : > { %2722 = vmatprep.subr.bf16.mxu1 %v1763_v54  ;;  %v1765_v6 = vpack.c.bf16 %v1313_v61, %v1309_v58  ;;  %v1767_v10 = vpack.c.bf16 %v1315_v63, %v1311_v62  ;;  %v1317_v35 = vmul.f32 %v675_v49, %v3739_v34  ;;  %v1321_v36 = vmul.f32 %v675_v49, %v3758_v43 }
  0xc2   : > { %v1308_v11 = vmul.f32 %v671_v47, %v3722_v27  ;;  %v1312_v15 = vmul.f32 %v671_v47, %v3725_v28  ;;  %v1310_v16 = vmul.f32 %v679_v3, %v3728_v29  ;;  %v1314_v19 = vmul.f32 %v679_v3, %v3731_v30 }
  0xc3   : > { %2551 = vmatpush1.bf16.msra.mxu0 %v1760_v59  ;;  %v1769_v24 = vpack.c.bf16 %v1321_v36, %v1317_v35  ;;  %v1319_v48 = vmul.f32 %v683_v12, %v3761_v44  ;;  %v1323_v2 = vmul.f32 %v683_v12, %v3764_v45  ;;  %v1316_v25 = vmul.f32 %v671_v47, %v3767_v46 }
  0xc4   : > { %2723 = vmatpush1.bf16.msra.mxu1 %v1762_v0  ;;  %2552 = vmatprep.subr.bf16.mxu0 %v1765_v6  ;;  %v1764_v49 = vpack.c.bf16 %v1312_v15, %v1308_v11  ;;  %v1766_v32 = vpack.c.bf16 %v1314_v19, %v1310_v16  ;;  %v1320_v33 = vmul.f32 %v671_v47, %v3782_v55 }
  0xc5   : > { %2724 = vmatprep.subr.bf16.mxu1 %v1767_v10  ;;  %v1771_v8 = vpack.c.bf16 %v1323_v2, %v1319_v48  ;;  %v1318_v39 = vmul.f32 %v679_v3, %v3789_v60  ;;  %v1322_v40 = vmul.f32 %v679_v3, %v3794_v1  ;;  %v384_v12 = vcombine.low %v3931_v4, %v3934_v50 }
  0xc6   : > { %v385_v41 = vcombine.high %v3931_v4, %v3934_v50  ;;  %v386_v42 = vcombine.low %v3937_v26, %v3940_v31  ;;  %v387_v9 = vcombine.high %v3937_v26, %v3940_v31  ;;  %v1768_v51 = vpack.c.bf16 %v1320_v33, %v1316_v25 }
  0xc7   : > { %2553 = vmatpush1.bf16.msra.mxu0 %v1764_v49  ;;  %v1770_v52 = vpack.c.bf16 %v1322_v40, %v1318_v39  ;;  %v3997_v53 = vrot.slane %v384_v12, %v3688_v5  ;;  %v4001_v54 = vcombine.high %v3981_v7, %v3984_v38 }
  0xc8   : > { %2725 = vmatpush1.bf16.msra.mxu1 %v1766_v32  ;;  %2554 = vmatprep.subr.bf16.mxu0 %v1769_v24  ;;  %v4004_v4 = vrot.slane %v385_v41, %v3688_v5  ;;  %v4007_v50 = vrot.slane %v386_v42, %v3688_v5  ;;  %v4010_v26 = vrot.slane %v387_v9, %v3688_v5 }
  0xc9   : > { %2726 = vmatprep.subr.bf16.mxu1 %v1771_v8  ;;  %v691_v31 = vrot.slane %v3997_v53, %v3697_v13  ;;  %v699_v56 = vrot.slane %v3997_v53, %v3699_v14  ;;  %v687_v57 = vrot.slane %v3997_v53, %v3702_v17  ;;  %v695_v58 = vrot.slane %v3997_v53, %v3704_v18 }
  0xca   : > { %v707_v59 = vrot.slane %v4004_v4, %v3697_v13  ;;  %v715_v61 = vrot.slane %v4004_v4, %v3699_v14  ;;  %v703_v62 = vrot.slane %v4004_v4, %v3702_v17  ;;  %v711_v63 = vrot.slane %v4004_v4, %v3704_v18 }
  0xcb   : > { %2555 = vmatpush1.bf16.msra.mxu0 %v1768_v51  ;;  %v1325_v0 = vmul.f32 %v691_v31, %v3707_v20  ;;  %v1329_v47 = vmul.f32 %v691_v31, %v3710_v21  ;;  %v1327_v3 = vmul.f32 %v699_v56, %v3713_v22  ;;  %v1331_v6 = vmul.f32 %v699_v56, %v3716_v23 }
  0xcc   : > { %2727 = vmatpush1.bf16.msra.mxu1 %v1770_v52  ;;  %v1324_v10 = vmul.f32 %v687_v57, %v3722_v27  ;;  %v1328_v35 = vmul.f32 %v687_v57, %v3725_v28  ;;  %v1326_v36 = vmul.f32 %v695_v58, %v3728_v29  ;;  %v1330_v11 = vmul.f32 %v695_v58, %v3731_v30 }
  0xcd   : > { %v1773_v15 = vpack.c.bf16 %v1329_v47, %v1325_v0  ;;  %v1775_v16 = vpack.c.bf16 %v1331_v6, %v1327_v3  ;;  %v1333_v19 = vmul.f32 %v691_v31, %v3739_v34  ;;  %v1337_v24 = vmul.f32 %v691_v31, %v3758_v43 }
  0xce   : > { %2557 = vmatmul.mubr.bf16.vlgmr.msra.gmra.mrb[0].mxu0 %v3747_v37  ;;  %v1772_v48 = vpack.c.bf16 %v1328_v35, %v1324_v10  ;;  %v1774_v2 = vpack.c.bf16 %v1330_v11, %v1326_v36  ;;  %v1335_v25 = vmul.f32 %v699_v56, %v3761_v44  ;;  %v1339_v49 = vmul.f32 %v699_v56, %v3764_v45 }
  0xcf   : > { %2567 = vmatprep.subr.bf16.mxu0 %v1773_v15  ;;  %2739 = vmatprep.subr.bf16.mxu1 %v1775_v16  ;;  %v1777_v32 = vpack.c.bf16 %v1337_v24, %v1333_v19  ;;  %v1332_v33 = vmul.f32 %v687_v57, %v3767_v46  ;;  %v1336_v8 = vmul.f32 %v687_v57, %v3782_v55 }
  0xd0   : > { %2568 = vmatpush1.bf16.msra.mxu0 %v1772_v48  ;;  %2729 = vmatmul.mubr.bf16.vlgmr.msra.gmra.mrb[0].mxu1 %v3747_v37  ;;  %v1779_v39 = vpack.c.bf16 %v1339_v49, %v1335_v25  ;;  %v1334_v40 = vmul.f32 %v695_v58, %v3789_v60  ;;  %v1338_v12 = vmul.f32 %v695_v58, %v3794_v1 }
  0xd1   : > { %2740 = vmatpush1.bf16.msra.mxu1 %v1774_v2  ;;  %2569 = vmatprep.subr.bf16.mxu0 %v1777_v32  ;;  %v1776_v41 = vpack.c.bf16 %v1336_v8, %v1332_v33  ;;  %v1341_v42 = vmul.f32 %v707_v59, %v3707_v20  ;;  %v1345_v9 = vmul.f32 %v707_v59, %v3710_v21 }
  0xd2   : > { %2741 = vmatprep.subr.bf16.mxu1 %v1779_v39  ;;  %v1778_v51 = vpack.c.bf16 %v1338_v12, %v1334_v40  ;;  %v1343_v52 = vmul.f32 %v715_v61, %v3713_v22  ;;  %v1347_v31 = vmul.f32 %v715_v61, %v3716_v23  ;;  %v1340_v37 = vmul.f32 %v703_v62, %v3722_v27 }
  0xd3   : > { %v1781_v56 = vpack.c.bf16 %v1345_v9, %v1341_v42  ;;  %v1344_v57 = vmul.f32 %v703_v62, %v3725_v28  ;;  %v1342_v58 = vmul.f32 %v711_v63, %v3728_v29  ;;  %v1346_v0 = vmul.f32 %v711_v63, %v3731_v30  ;;  %2599 = vmatprep.mubr.bf16.mxu0 %v4001_v54 }
  0xd4   : > { %2570 = vmatpush1.bf16.msra.mxu0 %v1776_v41  ;;  %v1783_v47 = vpack.c.bf16 %v1347_v31, %v1343_v52  ;;  %v1349_v3 = vmul.f32 %v707_v59, %v3739_v34  ;;  %v1353_v6 = vmul.f32 %v707_v59, %v3758_v43  ;;  %v1351_v10 = vmul.f32 %v715_v61, %v3761_v44 }
  0xd5   : > { %2742 = vmatpush1.bf16.msra.mxu1 %v1778_v51  ;;  %2571 = vmatprep.subr.bf16.mxu0 %v1781_v56  ;;  %v1780_v35 = vpack.c.bf16 %v1344_v57, %v1340_v37  ;;  %v1782_v36 = vpack.c.bf16 %v1346_v0, %v1342_v58  ;;  %v1355_v11 = vmul.f32 %v715_v61, %v3764_v45 }
  0xd6   : > { %2743 = vmatprep.subr.bf16.mxu1 %v1783_v47  ;;  %v1785_v15 = vpack.c.bf16 %v1353_v6, %v1349_v3  ;;  %v1348_v16 = vmul.f32 %v703_v62, %v3767_v46  ;;  %v1352_v19 = vmul.f32 %v703_v62, %v3782_v55  ;;  %v1350_v24 = vmul.f32 %v711_v63, %v3789_v60 }
  0xd7   : > { %v1787_v48 = vpack.c.bf16 %v1355_v11, %v1351_v10  ;;  %v1354_v2 = vmul.f32 %v711_v63, %v3794_v1  ;;  %v416_v59 = vcombine.high %v3997_v53, %v3997_v53  ;;  %v418_v25 = vcombine.high %v4004_v4, %v4004_v4  ;;  %2771 = vmatprep.mubr.bf16.mxu1 %v4001_v54 }
  0xd8   : > { %2572 = vmatpush1.bf16.msra.mxu0 %v1780_v35  ;;  %v1784_v61 = vpack.c.bf16 %v1352_v19, %v1348_v16  ;;  %v4070_v49 = vrot.slane %v4007_v50, %v3697_v13  ;;  %v4074_v62 = vrot.slane %v4007_v50, %v3699_v14  ;;  %v4078_v63 = vrot.slane %v4007_v50, %v3702_v17 }
  0xd9   : > { %2744 = vmatpush1.bf16.msra.mxu1 %v1782_v36  ;;  %2573 = vmatprep.subr.bf16.mxu0 %v1785_v15  ;;  %v1786_v53 = vpack.c.bf16 %v1354_v2, %v1350_v24  ;;  %v723_v4 = vrot.slane %v416_v59, %v3697_v13  ;;  %v731_v54 = vrot.slane %v416_v59, %v3699_v14 }
  0xda   : > { %2745 = vmatprep.subr.bf16.mxu1 %v1787_v48  ;;  %v719_v32 = vrot.slane %v416_v59, %v3702_v17  ;;  %v727_v33 = vrot.slane %v416_v59, %v3704_v18  ;;  %v739_v8 = vrot.slane %v418_v25, %v3697_v13  ;;  %v747_v39 = vrot.slane %v418_v25, %v3699_v14 }
  0xdb   : > { %v1357_v40 = vmul.f32 %v723_v4, %v3707_v20  ;;  %v1361_v12 = vmul.f32 %v723_v4, %v3710_v21  ;;  %v1359_v41 = vmul.f32 %v731_v54, %v3713_v22  ;;  %v1363_v42 = vmul.f32 %v731_v54, %v3716_v23 }
  0xdc   : > { %2574 = vmatpush1.bf16.msra.mxu0 %v1784_v61  ;;  %v1356_v9 = vmul.f32 %v719_v32, %v3722_v27  ;;  %v1360_v51 = vmul.f32 %v719_v32, %v3725_v28  ;;  %v1358_v52 = vmul.f32 %v727_v33, %v3728_v29  ;;  %v1362_v31 = vmul.f32 %v727_v33, %v3731_v30 }
  0xdd   : > { %2746 = vmatpush1.bf16.msra.mxu1 %v1786_v53  ;;  %v1789_v37 = vpack.c.bf16 %v1361_v12, %v1357_v40  ;;  %v1791_v56 = vpack.c.bf16 %v1363_v42, %v1359_v41  ;;  %v1365_v57 = vmul.f32 %v723_v4, %v3739_v34  ;;  %v1369_v58 = vmul.f32 %v723_v4, %v3758_v43 }
  0xde   : > { %v1788_v0 = vpack.c.bf16 %v1360_v51, %v1356_v9  ;;  %v1790_v47 = vpack.c.bf16 %v1362_v31, %v1358_v52  ;;  %v1367_v3 = vmul.f32 %v731_v54, %v3761_v44  ;;  %v1371_v6 = vmul.f32 %v731_v54, %v3764_v45 }
  0xdf   : > { %2575 = vmatprep.subr.bf16.mxu0 %v1789_v37  ;;  %2747 = vmatprep.subr.bf16.mxu1 %v1791_v56  ;;  %v1793_v10 = vpack.c.bf16 %v1369_v58, %v1365_v57  ;;  %v1364_v35 = vmul.f32 %v719_v32, %v3767_v46  ;;  %v1368_v36 = vmul.f32 %v719_v32, %v3782_v55 }
  0xe0   : > { %2576 = vmatpush1.bf16.msra.mxu0 %v1788_v0  ;;  %v1795_v11 = vpack.c.bf16 %v1371_v6, %v1367_v3  ;;  %v1366_v15 = vmul.f32 %v727_v33, %v3789_v60  ;;  %v1370_v16 = vmul.f32 %v727_v33, %v3794_v1  ;;  %v1373_v19 = vmul.f32 %v739_v8, %v3707_v20 }
  0xe1   : > { %2748 = vmatpush1.bf16.msra.mxu1 %v1790_v47  ;;  %2577 = vmatprep.subr.bf16.mxu0 %v1793_v10  ;;  %v1792_v24 = vpack.c.bf16 %v1368_v36, %v1364_v35  ;;  %v1377_v48 = vmul.f32 %v739_v8, %v3710_v21  ;;  %v1375_v2 = vmul.f32 %v747_v39, %v3713_v22 }
  0xe2   : > { %2749 = vmatprep.subr.bf16.mxu1 %v1795_v11  ;;  %v1794_v59 = vpack.c.bf16 %v1370_v16, %v1366_v15  ;;  %v1379_v61 = vmul.f32 %v747_v39, %v3716_v23  ;;  %v735_v53 = vrot.slane %v418_v25, %v3702_v17  ;;  %v743_v4 = vrot.slane %v418_v25, %v3704_v18 }
  0xe3   : > { %v1797_v54 = vpack.c.bf16 %v1377_v48, %v1373_v19  ;;  %v1381_v32 = vmul.f32 %v739_v8, %v3739_v34  ;;  %v1385_v33 = vmul.f32 %v739_v8, %v3758_v43  ;;  %v1383_v40 = vmul.f32 %v747_v39, %v3761_v44 }
  0xe4   : > { %2578 = vmatpush1.bf16.msra.mxu0 %v1792_v24  ;;  %v1799_v12 = vpack.c.bf16 %v1379_v61, %v1375_v2  ;;  %v1372_v41 = vmul.f32 %v735_v53, %v3722_v27  ;;  %v1376_v42 = vmul.f32 %v735_v53, %v3725_v28  ;;  %v1374_v9 = vmul.f32 %v743_v4, %v3728_v29 }
  0xe5   : > { %2750 = vmatpush1.bf16.msra.mxu1 %v1794_v59  ;;  %2579 = vmatprep.subr.bf16.mxu0 %v1797_v54  ;;  %v1378_v51 = vmul.f32 %v743_v4, %v3731_v30  ;;  %v1801_v25 = vpack.c.bf16 %v1385_v33, %v1381_v32  ;;  %v1387_v52 = vmul.f32 %v747_v39, %v3764_v45  ;;  %v4161_v59 = vld [vmem:[%s3675_s12 + $0x88] sm:$0xff] }
  0xe6   : > { %2751 = vmatprep.subr.bf16.mxu1 %v1799_v12  ;;  %v1796_v31 = vpack.c.bf16 %v1376_v42, %v1372_v41  ;;  %v1380_v8 = vmul.f32 %v735_v53, %v3767_v46  ;;  %v1384_v37 = vmul.f32 %v735_v53, %v3782_v55  ;;  %v1382_v56 = vmul.f32 %v743_v4, %v3789_v60  ;;  %v4165_v53 = vld [vmem:[%s3675_s12 + $0xa8] sm:$0xff]  ;;  %v4181_v41 = vld [vmem:[%s3675_s12 + $0x80] sm:$0xff] }
  0xe7   : > { %v1798_v57 = vpack.c.bf16 %v1378_v51, %v1374_v9  ;;  %v1803_v58 = vpack.c.bf16 %v1387_v52, %v1383_v40  ;;  %v1386_v0 = vmul.f32 %v743_v4, %v3794_v1  ;;  %v1389_v47 = vmul.f32 %v4070_v49, %v3707_v20  ;;  %v4169_v54 = vld [vmem:[%s3675_s12 + $0xc8] sm:$0xff]  ;;  %v4177_v40 = vld [vmem:[%s3675_s12 + $0xb8] sm:$0xff]  ;;  %v4185_v51 = vld [vmem:[%s3675_s12 + $0xa0] sm:$0xff] }
  0xe8   : > { %2580 = vmatpush1.bf16.msra.mxu0 %v1796_v31  ;;  %v1800_v3 = vpack.c.bf16 %v1384_v37, %v1380_v8  ;;  %v1393_v39 = vmul.f32 %v4070_v49, %v3710_v21  ;;  %v1391_v6 = vmul.f32 %v4074_v62, %v3713_v22  ;;  %v1395_v10 = vmul.f32 %v4074_v62, %v3716_v23  ;;  %v4189_v52 = vld [vmem:[%s3675_s12 + $0x90] sm:$0xff] }
  0xe9   : > { %2752 = vmatpush1.bf16.msra.mxu1 %v1798_v57  ;;  %2581 = vmatprep.subr.bf16.mxu0 %v1801_v25  ;;  %v1802_v35 = vpack.c.bf16 %v1386_v0, %v1382_v56  ;;  %v1388_v36 = vmul.f32 %v4078_v63, %v3722_v27  ;;  %v1392_v20 = vmul.f32 %v4078_v63, %v3725_v28  ;;  %v4193_v8 = vld [vmem:[%s3675_s12 + $0xb0] sm:$0xff]  ;;  %v4197_v57 = vld [vmem:[%s3675_s12 + $0xe8] sm:$0xff]  ;;  %v4201_v0 = vld [vmem:[%s3675_s12 + $0xd8] sm:$0xff] }
  0xea   : > { %2753 = vmatprep.subr.bf16.mxu1 %v1803_v58  ;;  %v1805_v11 = vpack.c.bf16 %v1393_v39, %v1389_v47  ;;  %v1807_v15 = vpack.c.bf16 %v1395_v10, %v1391_v6  ;;  %v759_v21 = vrot.slane %v4007_v50, %v3704_v18  ;;  %v1397_v22 = vmul.f32 %v4070_v49, %v3739_v34  ;;  %v3170_v6 = vld [vmem:[%s3675_s12 + $0x40] ss:$8 sps:$4 sm:$0xff]  }
  0xeb   : > { %v1804_v16 = vpack.c.bf16 %v1392_v20, %v1388_v36  ;;  %v1401_v23 = vmul.f32 %v4070_v49, %v3758_v43  ;;  %v1399_v19 = vmul.f32 %v4074_v62, %v3761_v44  ;;  %v1403_v27 = vmul.f32 %v4074_v62, %v3764_v45  ;;  %v4210_v36 = vld [vmem:[%s3675_s12 + $0xc0] sm:$0xff] }
  0xec   : > { %2582 = vmatpush1.bf16.msra.mxu0 %v1800_v3  ;;  %v1390_v28 = vmul.f32 %v759_v21, %v3728_v29  ;;  %v1394_v24 = vmul.f32 %v759_v21, %v3731_v30  ;;  %v1396_v48 = vmul.f32 %v4078_v63, %v3767_v46  ;;  %v1400_v34 = vmul.f32 %v4078_v63, %v3782_v55  ;;  %v4205_v3 = vld [vmem:[%s3675_s12 + $0xf8] sm:$0xff] }
  0xed   : > { %2754 = vmatpush1.bf16.msra.mxu1 %v1802_v35  ;;  %2583 = vmatprep.subr.bf16.mxu0 %v1805_v11  ;;  %v1809_v43 = vpack.c.bf16 %v1401_v23, %v1397_v22  ;;  %v1811_v44 = vpack.c.bf16 %v1403_v27, %v1399_v19  ;;  %v1398_v49 = vmul.f32 %v759_v21, %v3789_v60  ;;  %v4214_v11 = vld [vmem:[%s3675_s12 + $0xe0] sm:$0xff] }
  0xee   : > { %2755 = vmatprep.subr.bf16.mxu1 %v1807_v15  ;;  %v1806_v45 = vpack.c.bf16 %v1394_v24, %v1390_v28  ;;  %v1808_v29 = vpack.c.bf16 %v1400_v34, %v1396_v48  ;;  %v1402_v30 = vmul.f32 %v759_v21, %v3794_v1  ;;  %v771_v46 = vrot.slane %v4010_v26, %v3697_v13 }
  0xef   : > { %v779_v55 = vrot.slane %v4010_v26, %v3699_v14  ;;  %v767_v62 = vrot.slane %v4010_v26, %v3702_v17  ;;  %v775_v60 = vrot.slane %v4010_v26, %v3704_v18  ;;  %v417_v63 = vcombine.high %v4007_v50, %v4007_v50  ;;  %v4173_v50 = vld [vmem:[%s3675_s12 + $0x98] sm:$0xff] }
  0xf0   : > { %2584 = vmatpush1.bf16.msra.mxu0 %v1804_v16  ;;  %v1810_v2 = vpack.c.bf16 %v1402_v30, %v1398_v49  ;;  %v1405_v61 = vmul.f32 %v4161_v59, %v771_v46  ;;  %v1409_v4 = vmul.f32 %v4165_v53, %v771_v46  ;;  %v1413_v32 = vmul.f32 %v4169_v54, %v771_v46  ;;  %v4218_v16 = vld [vmem:[%s3675_s12 + $0xd0] sm:$0xff] }
  0xf1   : > { %2756 = vmatpush1.bf16.msra.mxu1 %v1806_v45  ;;  %2585 = vmatprep.subr.bf16.mxu0 %v1809_v43  ;;  %v1407_v33 = vmul.f32 %v4173_v50, %v779_v55  ;;  %v1411_v12 = vmul.f32 %v4177_v40, %v779_v55  ;;  %v1404_v42 = vmul.f32 %v4181_v41, %v767_v62 }
  0xf2   : > { %2757 = vmatprep.subr.bf16.mxu1 %v1811_v44  ;;  %v1813_v9 = vpack.c.bf16 %v1409_v4, %v1405_v61  ;;  %v1408_v25 = vmul.f32 %v4185_v51, %v767_v62  ;;  %v1406_v31 = vmul.f32 %v4189_v52, %v775_v60  ;;  %v1410_v37 = vmul.f32 %v4193_v8, %v775_v60 }
  0xf3   : > { %v1815_v56 = vpack.c.bf16 %v1411_v12, %v1407_v33  ;;  %v1417_v58 = vmul.f32 %v4197_v57, %v771_v46  ;;  %v1415_v47 = vmul.f32 %v4201_v0, %v779_v55  ;;  %v1419_v39 = vmul.f32 %v4205_v3, %v779_v55  ;;  %v3172_v33 = vld [vmem:[%s3675_s12 + $0x50] ss:$8 sps:$4 sm:$0xff]  }
  0xf4   : > { %2586 = vmatpush1.bf16.msra.mxu0 %v1808_v29  ;;  %v1812_v10 = vpack.c.bf16 %v1408_v25, %v1404_v42  ;;  %v1814_v35 = vpack.c.bf16 %v1410_v37, %v1406_v31  ;;  %v1412_v20 = vmul.f32 %v4210_v36, %v767_v62  ;;  %v1416_v15 = vmul.f32 %v4214_v11, %v767_v62 }
  0xf5   : > { %2758 = vmatpush1.bf16.msra.mxu1 %v1810_v2  ;;  %2587 = vmatprep.subr.bf16.mxu0 %v1813_v9  ;;  %v1817_v21 = vpack.c.bf16 %v1417_v58, %v1413_v32  ;;  %v1819_v22 = vpack.c.bf16 %v1419_v39, %v1415_v47  ;;  %v1414_v23 = vmul.f32 %v4218_v16, %v775_v60 }
  0xf6   : > { %2759 = vmatprep.subr.bf16.mxu1 %v1815_v56  ;;  %v1816_v19 = vpack.c.bf16 %v1416_v15, %v1412_v20  ;;  %v1418_v27 = vmul.f32 %v775_v60, %v3794_v1  ;;  %v787_v28 = vrot.slane %v417_v63, %v3697_v13  ;;  %v795_v24 = vrot.slane %v417_v63, %v3699_v14  ;;  %v4248_v56 = vld [vmem:[%s3675_s12 + $0xf0] sm:$0xff] }
  0xf7   : > { %v783_v48 = vrot.slane %v417_v63, %v3702_v17  ;;  %v791_v34 = vrot.slane %v417_v63, %v3704_v18  ;;  %v419_v43 = vcombine.high %v4010_v26, %v4010_v26  ;;  %v4229_v44 = vrot.slane %v3170_v6, %v3688_v5 }
  0xf8   : > { %2588 = vmatpush1.bf16.msra.mxu0 %v1812_v10  ;;  %v1818_v49 = vpack.c.bf16 %v1418_v27, %v1414_v23  ;;  %v1421_v45 = vmul.f32 %v4161_v59, %v787_v28  ;;  %v1425_v1 = vmul.f32 %v4165_v53, %v787_v28  ;;  %v1423_v29 = vmul.f32 %v4173_v50, %v795_v24 }
  0xf9   : > { %2760 = vmatpush1.bf16.msra.mxu1 %v1814_v35  ;;  %2589 = vmatprep.subr.bf16.mxu0 %v1817_v21  ;;  %v1427_v30 = vmul.f32 %v4177_v40, %v795_v24  ;;  %v1420_v46 = vmul.f32 %v4181_v41, %v783_v48  ;;  %v1424_v26 = vmul.f32 %v4185_v51, %v783_v48 }
  0xfa   : > { %2761 = vmatprep.subr.bf16.mxu1 %v1819_v22  ;;  %v1821_v55 = vpack.c.bf16 %v1425_v1, %v1421_v45  ;;  %v1422_v62 = vmul.f32 %v4189_v52, %v791_v34  ;;  %v1426_v60 = vmul.f32 %v4193_v8, %v791_v34  ;;  %v1429_v63 = vmul.f32 %v4169_v54, %v787_v28  ;;  %v3174_v1 = vld [vmem:[%s3675_s12 + $0x44] ss:$8 sps:$4 sm:$0xff]  }
  0xfb   : > { %v1823_v2 = vpack.c.bf16 %v1427_v30, %v1423_v29  ;;  %v1820_v61 = vpack.c.bf16 %v1424_v26, %v1420_v46  ;;  %v1433_v4 = vmul.f32 %v4197_v57, %v787_v28  ;;  %v1431_v32 = vmul.f32 %v4201_v0, %v795_v24 }
  0xfc   : > { %2590 = vmatpush1.bf16.msra.mxu0 %v1816_v19  ;;  %v1822_v12 = vpack.c.bf16 %v1426_v60, %v1422_v62  ;;  %v1435_v42 = vmul.f32 %v4205_v3, %v795_v24  ;;  %v1428_v9 = vmul.f32 %v4210_v36, %v783_v48  ;;  %v1432_v25 = vmul.f32 %v4214_v11, %v783_v48 }
  0xfd   : > { %2762 = vmatpush1.bf16.msra.mxu1 %v1818_v49  ;;  %2591 = vmatprep.subr.bf16.mxu0 %v1821_v55  ;;  %v1825_v31 = vpack.c.bf16 %v1433_v4, %v1429_v63  ;;  %v1430_v37 = vmul.f32 %v4218_v16, %v791_v34  ;;  %v1434_v58 = vmul.f32 %v4248_v56, %v791_v34  ;;  %v3175_v55 = vld [vmem:[%s3675_s12 + $0x54] ss:$8 sps:$4 sm:$0xff]  }
  0xfe   : > { %2763 = vmatprep.subr.bf16.mxu1 %v1823_v2  ;;  %v1827_v47 = vpack.c.bf16 %v1435_v42, %v1431_v32  ;;  %v1824_v39 = vpack.c.bf16 %v1432_v25, %v1428_v9  ;;  %v803_v6 = vrot.slane %v419_v43, %v3697_v13  ;;  %v811_v10 = vrot.slane %v419_v43, %v3699_v14  ;;  %v2226_v4 = vld [vmem:[%s3682_s9 + $0x30] sm:$0xff]  ;;  %v3176_v32 = vld [vmem:[%s3675_s12 + $0x60] ss:$8 sps:$4 sm:$0xff]  }
  0xff   : > { %v1826_v35 = vpack.c.bf16 %v1434_v58, %v1430_v37  ;;  %v799_v20 = vrot.slane %v419_v43, %v3702_v17  ;;  %v807_v15 = vrot.slane %v419_v43, %v3704_v18  ;;  %v444_v21 = vrot.slane %v3172_v33, %v3688_v5 }
 0x100   : > { %2592 = vmatpush1.bf16.msra.mxu0 %v1820_v61  ;;  %v1437_v22 = vmul.f32 %v4161_v59, %v803_v6  ;;  %v1441_v23 = vmul.f32 %v4165_v53, %v803_v6  ;;  %v1439_v19 = vmul.f32 %v4173_v50, %v811_v10  ;;  %v1443_v27 = vmul.f32 %v4177_v40, %v811_v10  ;;  %v2222_v61 = vld [vmem:[%s3682_s9 + $0x10] sm:$0xff] }
 0x101   : > { %2764 = vmatpush1.bf16.msra.mxu1 %v1822_v12  ;;  %2593 = vmatprep.subr.bf16.mxu0 %v1825_v31  ;;  %v1436_v28 = vmul.f32 %v4181_v41, %v799_v20  ;;  %v1440_v24 = vmul.f32 %v4185_v51, %v799_v20  ;;  %v1438_v48 = vmul.f32 %v4189_v52, %v807_v15 }
 0x102   : > { %2765 = vmatprep.subr.bf16.mxu1 %v1827_v47  ;;  %v1829_v34 = vpack.c.bf16 %v1441_v23, %v1437_v22  ;;  %v1831_v43 = vpack.c.bf16 %v1443_v27, %v1439_v19  ;;  %v1442_v49 = vmul.f32 %v4193_v8, %v807_v15  ;;  %v1445_v45 = vmul.f32 %v4169_v54, %v803_v6 }
 0x103   : > { %v1449_v29 = vmul.f32 %v4197_v57, %v803_v6  ;;  %v1447_v30 = vmul.f32 %v4201_v0, %v811_v10  ;;  %v1451_v46 = vmul.f32 %v4205_v3, %v811_v10  ;;  %v4271_v26 = vcombine.low %v3981_v7, %v3984_v38  ;;  %v3178_v7 = vld [vmem:[%s3675_s12 + $0x70] ss:$8 sps:$4 sm:$0xff]  }
 0x104   : > { %2594 = vmatpush1.bf16.msra.mxu0 %v1824_v39  ;;  %v1828_v62 = vpack.c.bf16 %v1440_v24, %v1436_v28  ;;  %v1444_v60 = vmul.f32 %v4210_v36, %v799_v20  ;;  %v1448_v63 = vmul.f32 %v4214_v11, %v799_v20  ;;  %v1446_v2 = vmul.f32 %v4218_v16, %v807_v15 }
 0x105   : > { %2766 = vmatpush1.bf16.msra.mxu1 %v1826_v35  ;;  %2595 = vmatprep.subr.bf16.mxu0 %v1829_v34  ;;  %v1830_v33 = vpack.c.bf16 %v1442_v49, %v1438_v48  ;;  %v1833_v12 = vpack.c.bf16 %v1449_v29, %v1445_v45  ;;  %v1450_v42 = vmul.f32 %v4248_v56, %v807_v15 }
 0x106   : > { %2767 = vmatprep.subr.bf16.mxu1 %v1831_v43  ;;  %v1835_v38 = vpack.c.bf16 %v1451_v46, %v1447_v30  ;;  %v452_v9 = vcombine.low %v4229_v44, %v444_v21  ;;  %v453_v25 = vcombine.high %v4229_v44, %v444_v21  ;;  %v4285_v31 = vrot.slane %v3174_v1, %v3688_v5 }
 0x107   : > { %v1832_v37 = vpack.c.bf16 %v1448_v63, %v1444_v60  ;;  %v1834_v58 = vpack.c.bf16 %v1450_v42, %v1446_v2  ;;  %v4288_v47 = vrot.slane %v3175_v55, %v3688_v5  ;;  %v4290_v39 = vcombine.low %v2222_v61, %v2226_v4 }
 0x108   : > { %2596 = vmatpush1.bf16.msra.mxu0 %v1828_v62  ;;  %v4293_v6 = vrot.slane %v452_v9, %v3688_v5  ;;  %v4296_v10 = vrot.slane %v453_v25, %v3688_v5  ;;  %v4298_v35 = vcombine.high %v2222_v61, %v2226_v4  ;;  %v4301_v44 = vrot.slane %v3176_v32, %v3688_v5 }
 0x109   : > { %2768 = vmatpush1.bf16.msra.mxu1 %v1830_v33  ;;  %2597 = vmatprep.subr.bf16.mxu0 %v1833_v12  ;;  %v454_v20 = vcombine.low %v4285_v31, %v4288_v47  ;;  %v455_v15 = vcombine.high %v4285_v31, %v4288_v47  ;;  %v4308_v21 = vrot.slane %v3178_v7, %v3688_v5 }
 0x10a   : > { %2769 = vmatprep.subr.bf16.mxu1 %v1835_v38  ;;  %v819_v22 = vrot.slane %v4293_v6, %v3697_v13  ;;  %v827_v23 = vrot.slane %v4293_v6, %v3699_v14  ;;  %v815_v19 = vrot.slane %v4293_v6, %v3702_v17  ;;  %v823_v27 = vrot.slane %v4293_v6, %v3704_v18 }
 0x10b   : > { %v835_v28 = vrot.slane %v4296_v10, %v3697_v13  ;;  %v843_v24 = vrot.slane %v4296_v10, %v3699_v14  ;;  %v831_v48 = vrot.slane %v4296_v10, %v3702_v17  ;;  %v839_v34 = vrot.slane %v4296_v10, %v3704_v18 }
 0x10c   : > { %2598 = vmatpush1.bf16.msra.mxu0 %v1832_v37  ;;  %v1453_v43 = vmul.f32 %v4161_v59, %v819_v22  ;;  %v1457_v49 = vmul.f32 %v4165_v53, %v819_v22  ;;  %v1455_v45 = vmul.f32 %v4173_v50, %v827_v23  ;;  %v1459_v1 = vmul.f32 %v4177_v40, %v827_v23 }
 0x10d   : > { %2770 = vmatpush1.bf16.msra.mxu1 %v1834_v58  ;;  %v1452_v29 = vmul.f32 %v4181_v41, %v815_v19  ;;  %v1456_v30 = vmul.f32 %v4185_v51, %v815_v19  ;;  %v1454_v46 = vmul.f32 %v4189_v52, %v823_v27  ;;  %v1458_v55 = vmul.f32 %v4193_v8, %v823_v27 }
 0x10e   : > { %v1837_v62 = vpack.c.bf16 %v1457_v49, %v1453_v43  ;;  %v1839_v60 = vpack.c.bf16 %v1459_v1, %v1455_v45  ;;  %v1461_v63 = vmul.f32 %v4169_v54, %v819_v22  ;;  %v1465_v2 = vmul.f32 %v4197_v57, %v819_v22 }
 0x10f   : > { %2600 = vmatmul.mubr.bf16.vlgmr.msra.gmra.mrb[0].mxu0 %v4271_v26  ;;  %v1836_v61 = vpack.c.bf16 %v1456_v30, %v1452_v29  ;;  %v1838_v4 = vpack.c.bf16 %v1458_v55, %v1454_v46  ;;  %v1463_v32 = vmul.f32 %v4201_v0, %v827_v23  ;;  %v1467_v33 = vmul.f32 %v4205_v3, %v827_v23 }
 0x110   : > { %2610 = vmatprep.subr.bf16.mxu0 %v1837_v62  ;;  %2782 = vmatprep.subr.bf16.mxu1 %v1839_v60  ;;  %v1841_v12 = vpack.c.bf16 %v1465_v2, %v1461_v63  ;;  %v1460_v42 = vmul.f32 %v4210_v36, %v815_v19  ;;  %v1464_v7 = vmul.f32 %v4214_v11, %v815_v19 }
 0x111   : > { %2611 = vmatpush1.bf16.msra.mxu0 %v1836_v61  ;;  %2772 = vmatmul.mubr.bf16.vlgmr.msra.gmra.mrb[0].mxu1 %v4271_v26  ;;  %v1843_v38 = vpack.c.bf16 %v1467_v33, %v1463_v32  ;;  %v1462_v9 = vmul.f32 %v4218_v16, %v823_v27  ;;  %v1466_v25 = vmul.f32 %v4248_v56, %v823_v27 }
 0x112   : > { %2783 = vmatpush1.bf16.msra.mxu1 %v1838_v4  ;;  %2612 = vmatprep.subr.bf16.mxu0 %v1841_v12  ;;  %v1840_v37 = vpack.c.bf16 %v1464_v7, %v1460_v42  ;;  %v1469_v58 = vmul.f32 %v4161_v59, %v835_v28  ;;  %v1473_v22 = vmul.f32 %v4165_v53, %v835_v28 }
 0x113   : > { %2784 = vmatprep.subr.bf16.mxu1 %v1843_v38  ;;  %v1842_v23 = vpack.c.bf16 %v1466_v25, %v1462_v9  ;;  %v1471_v43 = vmul.f32 %v4173_v50, %v843_v24  ;;  %v1475_v19 = vmul.f32 %v4177_v40, %v843_v24  ;;  %v1468_v26 = vmul.f32 %v4181_v41, %v831_v48 }
 0x114   : > { %v1845_v49 = vpack.c.bf16 %v1473_v22, %v1469_v58  ;;  %v1472_v45 = vmul.f32 %v4185_v51, %v831_v48  ;;  %v1470_v27 = vmul.f32 %v4189_v52, %v839_v34  ;;  %v1474_v1 = vmul.f32 %v4193_v8, %v839_v34  ;;  %2642 = vmatprep.mubr.bf16.mxu0 %v4298_v35 }
 0x115   : > { %2613 = vmatpush1.bf16.msra.mxu0 %v1840_v37  ;;  %v1847_v29 = vpack.c.bf16 %v1475_v19, %v1471_v43  ;;  %v1477_v30 = vmul.f32 %v4169_v54, %v835_v28  ;;  %v1481_v46 = vmul.f32 %v4197_v57, %v835_v28  ;;  %v1479_v55 = vmul.f32 %v4201_v0, %v843_v24 }
 0x116   : > { %2785 = vmatpush1.bf16.msra.mxu1 %v1842_v23  ;;  %2614 = vmatprep.subr.bf16.mxu0 %v1845_v49  ;;  %v1844_v62 = vpack.c.bf16 %v1472_v45, %v1468_v26  ;;  %v1846_v60 = vpack.c.bf16 %v1474_v1, %v1470_v27  ;;  %v1483_v63 = vmul.f32 %v4205_v3, %v843_v24 }
 0x117   : > { %2786 = vmatprep.subr.bf16.mxu1 %v1847_v29  ;;  %v1849_v2 = vpack.c.bf16 %v1481_v46, %v1477_v30  ;;  %v1476_v61 = vmul.f32 %v4210_v36, %v831_v48  ;;  %v1480_v4 = vmul.f32 %v4214_v11, %v831_v48  ;;  %v1478_v32 = vmul.f32 %v4218_v16, %v839_v34 }
 0x118   : > { %v1851_v33 = vpack.c.bf16 %v1483_v63, %v1479_v55  ;;  %v1482_v12 = vmul.f32 %v4248_v56, %v839_v34  ;;  %v484_v28 = vcombine.high %v4293_v6, %v4293_v6  ;;  %v486_v42 = vcombine.high %v4296_v10, %v4296_v10  ;;  %2814 = vmatprep.mubr.bf16.mxu1 %v4298_v35 }
 0x119   : > { %2615 = vmatpush1.bf16.msra.mxu0 %v1844_v62  ;;  %v1848_v24 = vpack.c.bf16 %v1480_v4, %v1476_v61  ;;  %v4370_v48 = vrot.slane %v454_v20, %v3688_v5  ;;  %v4376_v34 = vrot.slane %v455_v15, %v3688_v5  ;;  %v520_v6 = vcombine.low %v4301_v44, %v4308_v21 }
 0x11a   : > { %2787 = vmatpush1.bf16.msra.mxu1 %v1846_v60  ;;  %2616 = vmatprep.subr.bf16.mxu0 %v1849_v2  ;;  %v1850_v10 = vpack.c.bf16 %v1482_v12, %v1478_v32  ;;  %v851_v35 = vrot.slane %v484_v28, %v3697_v13  ;;  %v859_v7 = vrot.slane %v484_v28, %v3699_v14 }
 0x11b   : > { %2788 = vmatprep.subr.bf16.mxu1 %v1851_v33  ;;  %v847_v20 = vrot.slane %v484_v28, %v3702_v17  ;;  %v855_v38 = vrot.slane %v484_v28, %v3704_v18  ;;  %v867_v9 = vrot.slane %v486_v42, %v3697_v13  ;;  %v875_v31 = vrot.slane %v486_v42, %v3699_v14 }
 0x11c   : > { %v1485_v47 = vmul.f32 %v4161_v59, %v851_v35  ;;  %v1489_v15 = vmul.f32 %v4165_v53, %v851_v35  ;;  %v1487_v25 = vmul.f32 %v4173_v50, %v859_v7  ;;  %v1491_v37 = vmul.f32 %v4177_v40, %v859_v7 }
 0x11d   : > { %2617 = vmatpush1.bf16.msra.mxu0 %v1848_v24  ;;  %v1484_v58 = vmul.f32 %v4181_v41, %v847_v20  ;;  %v1488_v22 = vmul.f32 %v4185_v51, %v847_v20  ;;  %v1486_v23 = vmul.f32 %v4189_v52, %v855_v38  ;;  %v1490_v43 = vmul.f32 %v4193_v8, %v855_v38 }
 0x11e   : > { %2789 = vmatpush1.bf16.msra.mxu1 %v1850_v10  ;;  %v1853_v19 = vpack.c.bf16 %v1489_v15, %v1485_v47  ;;  %v1855_v26 = vpack.c.bf16 %v1491_v37, %v1487_v25  ;;  %v1493_v49 = vmul.f32 %v4169_v54, %v851_v35  ;;  %v1497_v45 = vmul.f32 %v4197_v57, %v851_v35 }
 0x11f   : > { %v1852_v27 = vpack.c.bf16 %v1488_v22, %v1484_v58  ;;  %v1854_v1 = vpack.c.bf16 %v1490_v43, %v1486_v23  ;;  %v1495_v29 = vmul.f32 %v4201_v0, %v859_v7  ;;  %v1499_v30 = vmul.f32 %v4205_v3, %v859_v7 }
 0x120   : > { %2618 = vmatprep.subr.bf16.mxu0 %v1853_v19  ;;  %2790 = vmatprep.subr.bf16.mxu1 %v1855_v26  ;;  %v1857_v46 = vpack.c.bf16 %v1497_v45, %v1493_v49  ;;  %v1492_v55 = vmul.f32 %v4210_v36, %v847_v20  ;;  %v1496_v62 = vmul.f32 %v4214_v11, %v847_v20 }
 0x121   : > { %2619 = vmatpush1.bf16.msra.mxu0 %v1852_v27  ;;  %v1859_v60 = vpack.c.bf16 %v1499_v30, %v1495_v29  ;;  %v1494_v63 = vmul.f32 %v4218_v16, %v855_v38  ;;  %v1498_v2 = vmul.f32 %v4248_v56, %v855_v38  ;;  %v1501_v61 = vmul.f32 %v4161_v59, %v867_v9 }
 0x122   : > { %2791 = vmatpush1.bf16.msra.mxu1 %v1854_v1  ;;  %2620 = vmatprep.subr.bf16.mxu0 %v1857_v46  ;;  %v1856_v4 = vpack.c.bf16 %v1496_v62, %v1492_v55  ;;  %v1505_v32 = vmul.f32 %v4165_v53, %v867_v9  ;;  %v1503_v33 = vmul.f32 %v4173_v50, %v875_v31 }
 0x123   : > { %2792 = vmatprep.subr.bf16.mxu1 %v1859_v60  ;;  %v1858_v12 = vpack.c.bf16 %v1498_v2, %v1494_v63  ;;  %v1507_v28 = vmul.f32 %v4177_v40, %v875_v31  ;;  %v863_v24 = vrot.slane %v486_v42, %v3702_v17  ;;  %v871_v10 = vrot.slane %v486_v42, %v3704_v18 }
 0x124   : > { %v1861_v35 = vpack.c.bf16 %v1505_v32, %v1501_v61  ;;  %v1509_v7 = vmul.f32 %v4169_v54, %v867_v9  ;;  %v1513_v20 = vmul.f32 %v4197_v57, %v867_v9  ;;  %v1511_v38 = vmul.f32 %v4201_v0, %v875_v31 }
 0x125   : > { %2621 = vmatpush1.bf16.msra.mxu0 %v1856_v4  ;;  %v1863_v47 = vpack.c.bf16 %v1507_v28, %v1503_v33  ;;  %v1500_v15 = vmul.f32 %v4181_v41, %v863_v24  ;;  %v1504_v25 = vmul.f32 %v4185_v51, %v863_v24  ;;  %v1502_v37 = vmul.f32 %v4189_v52, %v871_v10 }
 0x126   : > { %2793 = vmatpush1.bf16.msra.mxu1 %v1858_v12  ;;  %2622 = vmatprep.subr.bf16.mxu0 %v1861_v35  ;;  %v1506_v58 = vmul.f32 %v4193_v8, %v871_v10  ;;  %v1865_v42 = vpack.c.bf16 %v1513_v20, %v1509_v7  ;;  %v1515_v22 = vmul.f32 %v4205_v3, %v875_v31 }
 0x127   : > { %2794 = vmatprep.subr.bf16.mxu1 %v1863_v47  ;;  %v1860_v23 = vpack.c.bf16 %v1504_v25, %v1500_v15  ;;  %v1508_v9 = vmul.f32 %v4210_v36, %v863_v24  ;;  %v1512_v43 = vmul.f32 %v4214_v11, %v863_v24  ;;  %v1510_v19 = vmul.f32 %v4218_v16, %v871_v10 }
 0x128   : > { %v1862_v26 = vpack.c.bf16 %v1506_v58, %v1502_v37  ;;  %v1867_v49 = vpack.c.bf16 %v1515_v22, %v1511_v38  ;;  %v1514_v45 = vmul.f32 %v4248_v56, %v871_v10  ;;  %v883_v27 = vrot.slane %v4370_v48, %v3697_v13 }
 0x129   : > { %2623 = vmatpush1.bf16.msra.mxu0 %v1860_v23  ;;  %v1864_v1 = vpack.c.bf16 %v1512_v43, %v1508_v9  ;;  %v891_v31 = vrot.slane %v4370_v48, %v3699_v14  ;;  %v879_v29 = vrot.slane %v4370_v48, %v3702_v17  ;;  %v887_v30 = vrot.slane %v4370_v48, %v3704_v18 }
 0x12a   : > { %2795 = vmatpush1.bf16.msra.mxu1 %v1862_v26  ;;  %2624 = vmatprep.subr.bf16.mxu0 %v1865_v42  ;;  %v1866_v46 = vpack.c.bf16 %v1514_v45, %v1510_v19  ;;  %v1517_v55 = vmul.f32 %v4161_v59, %v883_v27  ;;  %v1521_v62 = vmul.f32 %v4165_v53, %v883_v27 }
 0x12b   : > { %2796 = vmatprep.subr.bf16.mxu1 %v1867_v49  ;;  %v1519_v60 = vmul.f32 %v4173_v50, %v891_v31  ;;  %v1523_v63 = vmul.f32 %v4177_v40, %v891_v31  ;;  %v1516_v2 = vmul.f32 %v4181_v41, %v879_v29  ;;  %v1520_v61 = vmul.f32 %v4185_v51, %v879_v29 }
 0x12c   : > { %v1869_v4 = vpack.c.bf16 %v1521_v62, %v1517_v55  ;;  %v1518_v32 = vmul.f32 %v4189_v52, %v887_v30  ;;  %v1522_v33 = vmul.f32 %v4193_v8, %v887_v30  ;;  %v1525_v12 = vmul.f32 %v4169_v54, %v883_v27 }
 0x12d   : > { %2625 = vmatpush1.bf16.msra.mxu0 %v1864_v1  ;;  %v1871_v28 = vpack.c.bf16 %v1523_v63, %v1519_v60  ;;  %v1868_v24 = vpack.c.bf16 %v1520_v61, %v1516_v2  ;;  %v1529_v10 = vmul.f32 %v4197_v57, %v883_v27  ;;  %v1527_v35 = vmul.f32 %v4201_v0, %v891_v31 }
 0x12e   : > { %2797 = vmatpush1.bf16.msra.mxu1 %v1866_v46  ;;  %2626 = vmatprep.subr.bf16.mxu0 %v1869_v4  ;;  %v1870_v7 = vpack.c.bf16 %v1522_v33, %v1518_v32  ;;  %v1531_v20 = vmul.f32 %v4205_v3, %v891_v31  ;;  %v1524_v38 = vmul.f32 %v4210_v36, %v879_v29 }
 0x12f   : > { %2798 = vmatprep.subr.bf16.mxu1 %v1871_v28  ;;  %v1873_v47 = vpack.c.bf16 %v1529_v10, %v1525_v12  ;;  %v1528_v15 = vmul.f32 %v4214_v11, %v879_v29  ;;  %v1526_v25 = vmul.f32 %v4218_v16, %v887_v30  ;;  %v1530_v37 = vmul.f32 %v4248_v56, %v887_v30 }
 0x130   : > { %v1875_v58 = vpack.c.bf16 %v1531_v20, %v1527_v35  ;;  %v899_v42 = vrot.slane %v4376_v34, %v3697_v13  ;;  %v907_v22 = vrot.slane %v4376_v34, %v3699_v14  ;;  %v895_v23 = vrot.slane %v4376_v34, %v3702_v17 }
 0x131   : > { %2627 = vmatpush1.bf16.msra.mxu0 %v1868_v24  ;;  %v1872_v9 = vpack.c.bf16 %v1528_v15, %v1524_v38  ;;  %v1874_v43 = vpack.c.bf16 %v1530_v37, %v1526_v25  ;;  %v903_v19 = vrot.slane %v4376_v34, %v3704_v18  ;;  %v485_v26 = vcombine.high %v4370_v48, %v4370_v48 }
 0x132   : > { %2799 = vmatpush1.bf16.msra.mxu1 %v1870_v7  ;;  %2628 = vmatprep.subr.bf16.mxu0 %v1873_v47  ;;  %v1533_v49 = vmul.f32 %v4161_v59, %v899_v42  ;;  %v1537_v45 = vmul.f32 %v4165_v53, %v899_v42  ;;  %v1535_v27 = vmul.f32 %v4173_v50, %v907_v22 }
 0x133   : > { %2800 = vmatprep.subr.bf16.mxu1 %v1875_v58  ;;  %v1539_v1 = vmul.f32 %v4177_v40, %v907_v22  ;;  %v1532_v31 = vmul.f32 %v4181_v41, %v895_v23  ;;  %v1536_v29 = vmul.f32 %v4185_v51, %v895_v23  ;;  %v1534_v30 = vmul.f32 %v4189_v52, %v903_v19 }
 0x134   : > { %v1877_v46 = vpack.c.bf16 %v1537_v45, %v1533_v49  ;;  %v1538_v48 = vmul.f32 %v4193_v8, %v903_v19  ;;  %v1541_v55 = vmul.f32 %v4169_v54, %v899_v42  ;;  %v1545_v62 = vmul.f32 %v4197_v57, %v899_v42 }
 0x135   : > { %2629 = vmatpush1.bf16.msra.mxu0 %v1872_v9  ;;  %v1879_v60 = vpack.c.bf16 %v1539_v1, %v1535_v27  ;;  %v1876_v63 = vpack.c.bf16 %v1536_v29, %v1532_v31  ;;  %v1543_v2 = vmul.f32 %v4201_v0, %v907_v22  ;;  %v1547_v61 = vmul.f32 %v4205_v3, %v907_v22 }
 0x136   : > { %2801 = vmatpush1.bf16.msra.mxu1 %v1874_v43  ;;  %2630 = vmatprep.subr.bf16.mxu0 %v1877_v46  ;;  %v1878_v4 = vpack.c.bf16 %v1538_v48, %v1534_v30  ;;  %v1881_v32 = vpack.c.bf16 %v1545_v62, %v1541_v55  ;;  %v1540_v33 = vmul.f32 %v4210_v36, %v895_v23 }
 0x137   : > { %2802 = vmatprep.subr.bf16.mxu1 %v1879_v60  ;;  %v1883_v12 = vpack.c.bf16 %v1547_v61, %v1543_v2  ;;  %v1544_v28 = vmul.f32 %v4214_v11, %v895_v23  ;;  %v1542_v24 = vmul.f32 %v4218_v16, %v903_v19  ;;  %v1546_v10 = vmul.f32 %v4248_v56, %v903_v19 }
 0x138   : > { %v915_v35 = vrot.slane %v485_v26, %v3697_v13  ;;  %v923_v7 = vrot.slane %v485_v26, %v3699_v14  ;;  %v911_v20 = vrot.slane %v485_v26, %v3702_v17  ;;  %v919_v38 = vrot.slane %v485_v26, %v3704_v18 }
 0x139   : > { %2631 = vmatpush1.bf16.msra.mxu0 %v1876_v63  ;;  %v1880_v47 = vpack.c.bf16 %v1544_v28, %v1540_v33  ;;  %v1882_v15 = vpack.c.bf16 %v1546_v10, %v1542_v24  ;;  %v487_v25 = vcombine.high %v4376_v34, %v4376_v34  ;;  %v4480_v37 = vrot.slane %v520_v6, %v3688_v5 }
 0x13a   : > { %2803 = vmatpush1.bf16.msra.mxu1 %v1878_v4  ;;  %2632 = vmatprep.subr.bf16.mxu0 %v1881_v32  ;;  %v1549_v58 = vmul.f32 %v4161_v59, %v915_v35  ;;  %v1553_v42 = vmul.f32 %v4165_v53, %v915_v35  ;;  %v1551_v22 = vmul.f32 %v4173_v50, %v923_v7 }
 0x13b   : > { %2804 = vmatprep.subr.bf16.mxu1 %v1883_v12  ;;  %v1555_v23 = vmul.f32 %v4177_v40, %v923_v7  ;;  %v1548_v9 = vmul.f32 %v4181_v41, %v911_v20  ;;  %v1552_v34 = vmul.f32 %v4185_v51, %v911_v20  ;;  %v1550_v43 = vmul.f32 %v4189_v52, %v919_v38 }
 0x13c   : > { %v1885_v19 = vpack.c.bf16 %v1553_v42, %v1549_v58  ;;  %v1554_v6 = vmul.f32 %v4193_v8, %v919_v38  ;;  %v1557_v26 = vmul.f32 %v4169_v54, %v915_v35  ;;  %v1561_v49 = vmul.f32 %v4197_v57, %v915_v35 }
 0x13d   : > { %2633 = vmatpush1.bf16.msra.mxu0 %v1880_v47  ;;  %v1887_v45 = vpack.c.bf16 %v1555_v23, %v1551_v22  ;;  %v1884_v27 = vpack.c.bf16 %v1552_v34, %v1548_v9  ;;  %v1559_v1 = vmul.f32 %v4201_v0, %v923_v7  ;;  %v1563_v31 = vmul.f32 %v4205_v3, %v923_v7 }
 0x13e   : > { %2805 = vmatpush1.bf16.msra.mxu1 %v1882_v15  ;;  %2634 = vmatprep.subr.bf16.mxu0 %v1885_v19  ;;  %v1886_v29 = vpack.c.bf16 %v1554_v6, %v1550_v43  ;;  %v1889_v30 = vpack.c.bf16 %v1561_v49, %v1557_v26  ;;  %v1556_v46 = vmul.f32 %v4210_v36, %v911_v20 }
 0x13f   : > { %2806 = vmatprep.subr.bf16.mxu1 %v1887_v45  ;;  %v1891_v48 = vpack.c.bf16 %v1563_v31, %v1559_v1  ;;  %v1560_v55 = vmul.f32 %v4214_v11, %v911_v20  ;;  %v1558_v62 = vmul.f32 %v4218_v16, %v919_v38  ;;  %v1562_v60 = vmul.f32 %v4248_v56, %v919_v38 }
 0x140   : > { %v931_v63 = vrot.slane %v487_v25, %v3697_v13  ;;  %v939_v2 = vrot.slane %v487_v25, %v3699_v14  ;;  %v927_v61 = vrot.slane %v487_v25, %v3702_v17  ;;  %v935_v4 = vrot.slane %v487_v25, %v3704_v18 }
 0x141   : > { %2635 = vmatpush1.bf16.msra.mxu0 %v1884_v27  ;;  %v1888_v32 = vpack.c.bf16 %v1560_v55, %v1556_v46  ;;  %v1890_v33 = vpack.c.bf16 %v1562_v60, %v1558_v62  ;;  %v947_v12 = vrot.slane %v4480_v37, %v3697_v13  ;;  %v955_v28 = vrot.slane %v4480_v37, %v3699_v14  ;;  %v3180_v60 = vld [vmem:[%s3675_s12 + $0x64] ss:$8 sps:$4 sm:$0xff]  }
 0x142   : > { %2807 = vmatpush1.bf16.msra.mxu1 %v1886_v29  ;;  %2636 = vmatprep.subr.bf16.mxu0 %v1889_v30  ;;  %v1565_v24 = vmul.f32 %v4161_v59, %v931_v63  ;;  %v1569_v10 = vmul.f32 %v4165_v53, %v931_v63  ;;  %v1567_v35 = vmul.f32 %v4173_v50, %v939_v2 }
 0x143   : > { %2808 = vmatprep.subr.bf16.mxu1 %v1891_v48  ;;  %v1571_v7 = vmul.f32 %v4177_v40, %v939_v2  ;;  %v1564_v20 = vmul.f32 %v4181_v41, %v927_v61  ;;  %v1568_v38 = vmul.f32 %v4185_v51, %v927_v61  ;;  %v1566_v47 = vmul.f32 %v4189_v52, %v935_v4 }
 0x144   : > { %v1893_v15 = vpack.c.bf16 %v1569_v10, %v1565_v24  ;;  %v1570_v25 = vmul.f32 %v4193_v8, %v935_v4  ;;  %v1573_v58 = vmul.f32 %v4169_v54, %v931_v63  ;;  %v1577_v42 = vmul.f32 %v4197_v57, %v931_v63  ;;  %v3181_v10 = vld [vmem:[%s3675_s12 + $0x74] ss:$8 sps:$4 sm:$0xff]  }
 0x145   : > { %2637 = vmatpush1.bf16.msra.mxu0 %v1888_v32  ;;  %v1895_v22 = vpack.c.bf16 %v1571_v7, %v1567_v35  ;;  %v1892_v23 = vpack.c.bf16 %v1568_v38, %v1564_v20  ;;  %v1575_v9 = vmul.f32 %v4201_v0, %v939_v2  ;;  %v1579_v34 = vmul.f32 %v4205_v3, %v939_v2 }
 0x146   : > { %2809 = vmatpush1.bf16.msra.mxu1 %v1890_v33  ;;  %2638 = vmatprep.subr.bf16.mxu0 %v1893_v15  ;;  %v1894_v43 = vpack.c.bf16 %v1570_v25, %v1566_v47  ;;  %v1897_v19 = vpack.c.bf16 %v1577_v42, %v1573_v58  ;;  %v1572_v6 = vmul.f32 %v4210_v36, %v927_v61  ;;  %v4547_v42 = vld [vmem:[%s3682_s9 + $0x18] sm:$0xff] }
 0x147   : > { %2810 = vmatprep.subr.bf16.mxu1 %v1895_v22  ;;  %v1899_v26 = vpack.c.bf16 %v1579_v34, %v1575_v9  ;;  %v1576_v49 = vmul.f32 %v4214_v11, %v927_v61  ;;  %v1574_v45 = vmul.f32 %v4218_v16, %v935_v4  ;;  %v1578_v27 = vmul.f32 %v4248_v56, %v935_v4  ;;  %v4550_v22 = vld [vmem:[%s3682_s9 + $0x38] sm:$0xff] }
 0x148   : > { %v1581_v1 = vmul.f32 %v4161_v59, %v947_v12  ;;  %v1585_v31 = vmul.f32 %v4165_v53, %v947_v12  ;;  %v1583_v29 = vmul.f32 %v4173_v50, %v955_v28  ;;  %v1587_v30 = vmul.f32 %v4177_v40, %v955_v28 }
 0x149   : > { %2639 = vmatpush1.bf16.msra.mxu0 %v1892_v23  ;;  %v1896_v46 = vpack.c.bf16 %v1576_v49, %v1572_v6  ;;  %v1898_v48 = vpack.c.bf16 %v1578_v27, %v1574_v45  ;;  %v943_v55 = vrot.slane %v4480_v37, %v3702_v17  ;;  %v951_v62 = vrot.slane %v4480_v37, %v3704_v18 }
 0x14a   : > { %2811 = vmatpush1.bf16.msra.mxu1 %v1894_v43  ;;  %2640 = vmatprep.subr.bf16.mxu0 %v1897_v19  ;;  %v1901_v63 = vpack.c.bf16 %v1585_v31, %v1581_v1  ;;  %v1903_v2 = vpack.c.bf16 %v1587_v30, %v1583_v29  ;;  %v1589_v61 = vmul.f32 %v4169_v54, %v947_v12 }
 0x14b   : > { %2812 = vmatprep.subr.bf16.mxu1 %v1899_v26  ;;  %v1580_v4 = vmul.f32 %v4181_v41, %v943_v55  ;;  %v1584_v32 = vmul.f32 %v4185_v51, %v943_v55  ;;  %v1582_v33 = vmul.f32 %v4189_v52, %v951_v62  ;;  %v1586_v24 = vmul.f32 %v4193_v8, %v951_v62 }
 0x14c   : > { %v1593_v35 = vmul.f32 %v4197_v57, %v947_v12  ;;  %v1591_v7 = vmul.f32 %v4201_v0, %v955_v28  ;;  %v1595_v20 = vmul.f32 %v4205_v3, %v955_v28  ;;  %v1588_v38 = vmul.f32 %v4210_v36, %v943_v55 }
 0x14d   : > { %2641 = vmatpush1.bf16.msra.mxu0 %v1896_v46  ;;  %v1900_v47 = vpack.c.bf16 %v1584_v32, %v1580_v4  ;;  %v1592_v15 = vmul.f32 %v4214_v11, %v943_v55  ;;  %v1590_v25 = vmul.f32 %v4218_v16, %v951_v62  ;;  %v4544_v58 = vrot.slane %v3180_v60, %v3688_v5 }
 0x14e   : > { %2813 = vmatpush1.bf16.msra.mxu1 %v1898_v48  ;;  %2653 = vmatprep.subr.bf16.mxu0 %v1901_v63  ;;  %v1902_v12 = vpack.c.bf16 %v1586_v24, %v1582_v33  ;;  %v1905_v23 = vpack.c.bf16 %v1593_v35, %v1589_v61  ;;  %v1594_v28 = vmul.f32 %v4248_v56, %v951_v62 }
 0x14f   : > { %2825 = vmatprep.subr.bf16.mxu1 %v1903_v2  ;;  %v1907_v9 = vpack.c.bf16 %v1595_v20, %v1591_v7  ;;  %v521_v34 = vcombine.high %v4301_v44, %v4308_v21  ;;  %v552_v43 = vcombine.high %v4480_v37, %v4480_v37  ;;  %v4558_v19 = vrot.slane %v3181_v10, %v3688_v5 }
 0x150   : > { %2643 = vmatmul.mubr.bf16.vlgmr.msra.gmra.mrb[0].mxu0 %v4290_v39  ;;  %v1904_v6 = vpack.c.bf16 %v1592_v15, %v1588_v38  ;;  %v1906_v26 = vpack.c.bf16 %v1594_v28, %v1590_v25  ;;  %v3024_v49 = vcombine.high %v4547_v42, %v4550_v22  ;;  %v4619_v15 = vld [vmem:[%s3675_s12 + $0xa0] sm:$0xff]  ;;  %v4624_v25 = vld [vmem:[%s3675_s12 + $0x90] sm:$0xff] }
 0x151   : > { %2654 = vmatpush1.bf16.msra.mxu0 %v1900_v47  ;;  %2815 = vmatmul.mubr.bf16.vlgmr.msra.gmra.mrb[0].mxu1 %v4290_v39  ;;  %v4565_v45 = vrot.slane %v521_v34, %v3688_v5  ;;  %v4568_v44 = vrot.slane %v552_v43, %v3697_v13  ;;  %v4571_v21 = vrot.slane %v552_v43, %v3699_v14  ;;  %v4614_v47 = vld [vmem:[%s3675_s12 + $0x80] sm:$0xff] }
 0x152   : > { %2826 = vmatpush1.bf16.msra.mxu1 %v1902_v12  ;;  %2655 = vmatprep.subr.bf16.mxu0 %v1905_v23  ;;  %v4574_v37 = vrot.slane %v552_v43, %v3702_v17  ;;  %v4577_v27 = vrot.slane %v552_v43, %v3704_v18  ;;  %v522_v39 = vcombine.low %v4544_v58, %v4558_v19  ;;  %v4629_v23 = vld [vmem:[%s3675_s12 + $0xb0] sm:$0xff]  ;;  %v4639_v43 = vld [vmem:[%s3675_s12 + $0xe8] sm:$0xff] }
 0x153   : > { %2827 = vmatprep.subr.bf16.mxu1 %v1907_v9  ;;  %v963_v1 = vrot.slane %v4565_v45, %v3697_v13  ;;  %v971_v31 = vrot.slane %v4565_v45, %v3699_v14  ;;  %v959_v29 = vrot.slane %v4565_v45, %v3702_v17  ;;  %v967_v30 = vrot.slane %v4565_v45, %v3704_v18  ;;  %v4634_v9 = vld [vmem:[%s3675_s12 + $0xc8] sm:$0xff] }
 0x154   : > { %v1613_v46 = vmul.f32 %v4161_v59, %v4568_v44  ;;  %v1617_v48 = vmul.f32 %v4165_v53, %v4568_v44  ;;  %v1615_v55 = vmul.f32 %v4173_v50, %v4571_v21  ;;  %v1619_v62 = vmul.f32 %v4177_v40, %v4571_v21  ;;  %2685 = vmatprep.mubr.bf16.mxu0 %v3024_v49 }
 0x155   : > { %2656 = vmatpush1.bf16.msra.mxu0 %v1904_v6  ;;  %v1597_v60 = vmul.f32 %v4161_v59, %v963_v1  ;;  %v1601_v63 = vmul.f32 %v4165_v53, %v963_v1  ;;  %v1599_v2 = vmul.f32 %v4173_v50, %v971_v31  ;;  %v1603_v61 = vmul.f32 %v4177_v40, %v971_v31 }
 0x156   : > { %2828 = vmatpush1.bf16.msra.mxu1 %v1906_v26  ;;  %v1596_v4 = vmul.f32 %v4181_v41, %v959_v29  ;;  %v1600_v32 = vmul.f32 %v4185_v51, %v959_v29  ;;  %v1598_v33 = vmul.f32 %v4189_v52, %v967_v30  ;;  %v1602_v24 = vmul.f32 %v4193_v8, %v967_v30  ;;  %v4644_v26 = vld [vmem:[%s3675_s12 + $0xd8] sm:$0xff] }
 0x157   : > { %v1909_v10 = vpack.c.bf16 %v1601_v63, %v1597_v60  ;;  %v1911_v35 = vpack.c.bf16 %v1603_v61, %v1599_v2  ;;  %v1605_v7 = vmul.f32 %v4169_v54, %v963_v1  ;;  %v1609_v59 = vmul.f32 %v4197_v57, %v963_v1  ;;  %2857 = vmatprep.mubr.bf16.mxu1 %v3024_v49  ;;  %v4649_v1 = vld [vmem:[%s3675_s12 + $0xf8] sm:$0xff]  ;;  %v4664_v63 = vld [vmem:[%s3675_s12 + $0xd0] sm:$0xff] }
 0x158   : > { %v1908_v53 = vpack.c.bf16 %v1600_v32, %v1596_v4  ;;  %v1910_v50 = vpack.c.bf16 %v1602_v24, %v1598_v33  ;;  %v1607_v40 = vmul.f32 %v4201_v0, %v971_v31  ;;  %v1611_v41 = vmul.f32 %v4205_v3, %v971_v31 }
 0x159   : > { %2657 = vmatprep.subr.bf16.mxu0 %v1909_v10  ;;  %2829 = vmatprep.subr.bf16.mxu1 %v1911_v35  ;;  %v1913_v51 = vpack.c.bf16 %v1609_v59, %v1605_v7  ;;  %v1604_v52 = vmul.f32 %v4210_v36, %v959_v29  ;;  %v1608_v8 = vmul.f32 %v4214_v11, %v959_v29  ;;  %v4687_v10 = vld [vmem:[%s3675_s12 + $0x88] sm:$0xff]  ;;  %v4695_v7 = vld [vmem:[%s3675_s12 + $0x98] sm:$0xff] }
 0x15a   : > { %2658 = vmatpush1.bf16.msra.mxu0 %v1908_v53  ;;  %2830 = vmatpush1.bf16.msra.mxu1 %v1910_v50  ;;  %v1915_v54 = vpack.c.bf16 %v1611_v41, %v1607_v40  ;;  %v1606_v57 = vmul.f32 %v4218_v16, %v967_v30  ;;  %v1610_v0 = vmul.f32 %v4248_v56, %v967_v30  ;;  %v4699_v53 = vld [vmem:[%s3675_s12 + $0xb8] sm:$0xff] }
 0x15b   : > { %2659 = vmatprep.subr.bf16.mxu0 %v1913_v51  ;;  %v1912_v3 = vpack.c.bf16 %v1608_v8, %v1604_v52  ;;  %v1917_v20 = vpack.c.bf16 %v1617_v48, %v1613_v46  ;;  %v1919_v38 = vpack.c.bf16 %v1619_v62, %v1615_v55  ;;  %v1612_v36 = vmul.f32 %v4614_v47, %v4574_v37  ;;  %v4654_v46 = vld [vmem:[%s3675_s12 + $0xc0] sm:$0xff] }
 0x15c   : > { %2831 = vmatprep.subr.bf16.mxu1 %v1915_v54  ;;  %v1914_v11 = vpack.c.bf16 %v1610_v0, %v1606_v57  ;;  %v1616_v16 = vmul.f32 %v4619_v15, %v4574_v37  ;;  %v1614_v12 = vmul.f32 %v4624_v25, %v4577_v27  ;;  %v1618_v28 = vmul.f32 %v4629_v23, %v4577_v27  ;;  %v4659_v62 = vld [vmem:[%s3675_s12 + $0xe0] sm:$0xff] }
 0x15d   : > { %v1621_v34 = vmul.f32 %v4634_v9, %v4568_v44  ;;  %v1625_v6 = vmul.f32 %v4639_v43, %v4568_v44  ;;  %v1623_v49 = vmul.f32 %v4644_v26, %v4571_v21  ;;  %v1627_v31 = vmul.f32 %v4649_v1, %v4571_v21 }
 0x15e   : > { %2660 = vmatpush1.bf16.msra.mxu0 %v1912_v3  ;;  %2832 = vmatpush1.bf16.msra.mxu1 %v1914_v11  ;;  %v1916_v29 = vpack.c.bf16 %v1616_v16, %v1612_v36  ;;  %v1918_v30 = vpack.c.bf16 %v1618_v28, %v1614_v12  ;;  %v1620_v44 = vmul.f32 %v4654_v46, %v4574_v37 }
 0x15f   : > { %2661 = vmatprep.subr.bf16.mxu0 %v1917_v20  ;;  %2833 = vmatprep.subr.bf16.mxu1 %v1919_v38  ;;  %v1921_v48 = vpack.c.bf16 %v1625_v6, %v1621_v34  ;;  %v1923_v55 = vpack.c.bf16 %v1627_v31, %v1623_v49  ;;  %v1624_v60 = vmul.f32 %v4659_v62, %v4574_v37  ;;  %v4714_v34 = vld [vmem:[%s3675_s12 + $0xf0] sm:$0xff] }
 0x160   : > { %v1622_v21 = vmul.f32 %v4664_v63, %v4577_v27  ;;  %v1626_v2 = vmul.f32 %v4248_v56, %v4577_v27  ;;  %v554_v61 = vcombine.high %v4565_v45, %v4565_v45  ;;  %v4676_v4 = vrot.slane %v522_v39, %v3688_v5 }
 0x161   : > { %v1920_v37 = vpack.c.bf16 %v1624_v60, %v1620_v44  ;;  %v523_v32 = vcombine.high %v4544_v58, %v4558_v19  ;;  %v4691_v19 = vld [vmem:[%s3675_s12 + $0xa8] sm:$0xff] }
 0x162   : > { %2662 = vmatpush1.bf16.msra.mxu0 %v1916_v29  ;;  %2834 = vmatpush1.bf16.msra.mxu1 %v1918_v30  ;;  %v1922_v33 = vpack.c.bf16 %v1626_v2, %v1622_v21  ;;  %v995_v56 = vrot.slane %v554_v61, %v3697_v13  ;;  %v1003_v45 = vrot.slane %v554_v61, %v3699_v14 }
 0x163   : > { %2663 = vmatprep.subr.bf16.mxu0 %v1921_v48  ;;  %2835 = vmatprep.subr.bf16.mxu1 %v1923_v55  ;;  %v991_v27 = vrot.slane %v554_v61, %v3702_v17  ;;  %v999_v39 = vrot.slane %v554_v61, %v3704_v18  ;;  %v1011_v24 = vrot.slane %v4676_v4, %v3697_v13 }
 0x164   : > { %v1629_v58 = vmul.f32 %v4687_v10, %v995_v56  ;;  %v1633_v35 = vmul.f32 %v4691_v19, %v995_v56  ;;  %v1631_v59 = vmul.f32 %v4695_v7, %v1003_v45  ;;  %v1635_v50 = vmul.f32 %v4699_v53, %v1003_v45 }
 0x165   : > { %v1628_v40 = vmul.f32 %v4614_v47, %v991_v27  ;;  %v1632_v41 = vmul.f32 %v4619_v15, %v991_v27  ;;  %v1630_v51 = vmul.f32 %v4624_v25, %v999_v39  ;;  %v1634_v52 = vmul.f32 %v4629_v23, %v999_v39 }
 0x166   : > { %2664 = vmatpush1.bf16.msra.mxu0 %v1920_v37  ;;  %2836 = vmatpush1.bf16.msra.mxu1 %v1922_v33  ;;  %v1925_v8 = vpack.c.bf16 %v1633_v35, %v1629_v58  ;;  %v1927_v54 = vpack.c.bf16 %v1635_v50, %v1631_v59  ;;  %v1637_v57 = vmul.f32 %v4634_v9, %v995_v56 }
 0x167   : > { %v1924_v0 = vpack.c.bf16 %v1632_v41, %v1628_v40  ;;  %v1926_v3 = vpack.c.bf16 %v1634_v52, %v1630_v51  ;;  %v1641_v20 = vmul.f32 %v4639_v43, %v995_v56  ;;  %v1639_v38 = vmul.f32 %v4644_v26, %v1003_v45 }
 0x168   : > { %2665 = vmatprep.subr.bf16.mxu0 %v1925_v8  ;;  %2837 = vmatprep.subr.bf16.mxu1 %v1927_v54  ;;  %v1643_v36 = vmul.f32 %v4649_v1, %v1003_v45  ;;  %v1636_v11 = vmul.f32 %v4654_v46, %v991_v27  ;;  %v1640_v16 = vmul.f32 %v4659_v62, %v991_v27 }
 0x169   : > { %v1929_v12 = vpack.c.bf16 %v1641_v20, %v1637_v57  ;;  %v1638_v28 = vmul.f32 %v4664_v63, %v999_v39  ;;  %v1642_v6 = vmul.f32 %v4714_v34, %v999_v39  ;;  %v1645_v49 = vmul.f32 %v4687_v10, %v1011_v24 }
 0x16a   : > { %2666 = vmatpush1.bf16.msra.mxu0 %v1924_v0  ;;  %2838 = vmatpush1.bf16.msra.mxu1 %v1926_v3  ;;  %v1931_v31 = vpack.c.bf16 %v1643_v36, %v1639_v38  ;;  %v1928_v29 = vpack.c.bf16 %v1640_v16, %v1636_v11  ;;  %v1649_v30 = vmul.f32 %v4691_v19, %v1011_v24 }
 0x16b   : > { %2667 = vmatprep.subr.bf16.mxu0 %v1929_v12  ;;  %v1930_v44 = vpack.c.bf16 %v1642_v6, %v1638_v28  ;;  %v1019_v48 = vrot.slane %v4676_v4, %v3699_v14  ;;  %v1007_v55 = vrot.slane %v4676_v4, %v3702_v17  ;;  %v1015_v60 = vrot.slane %v4676_v4, %v3704_v18 }
 0x16c   : > { %2839 = vmatprep.subr.bf16.mxu1 %v1931_v31  ;;  %v1933_v21 = vpack.c.bf16 %v1649_v30, %v1645_v49  ;;  %v1653_v2 = vmul.f32 %v4634_v9, %v1011_v24  ;;  %v1657_v61 = vmul.f32 %v4639_v43, %v1011_v24  ;;  %v551_v37 = vrot.slane %v523_v32, %v3688_v5 }
 0x16d   : > { %v1647_v33 = vmul.f32 %v4695_v7, %v1019_v48  ;;  %v1651_v56 = vmul.f32 %v4699_v53, %v1019_v48  ;;  %v1644_v45 = vmul.f32 %v4614_v47, %v1007_v55  ;;  %v1648_v27 = vmul.f32 %v4619_v15, %v1007_v55 }
 0x16e   : > { %2668 = vmatpush1.bf16.msra.mxu0 %v1928_v29  ;;  %2840 = vmatpush1.bf16.msra.mxu1 %v1930_v44  ;;  %v1646_v39 = vmul.f32 %v4624_v25, %v1015_v60  ;;  %v1650_v58 = vmul.f32 %v4629_v23, %v1015_v60  ;;  %v1937_v35 = vpack.c.bf16 %v1657_v61, %v1653_v2 }
 0x16f   : > { %2669 = vmatprep.subr.bf16.mxu0 %v1933_v21  ;;  %v1935_v59 = vpack.c.bf16 %v1651_v56, %v1647_v33  ;;  %v1932_v24 = vpack.c.bf16 %v1648_v27, %v1644_v45  ;;  %v1655_v5 = vmul.f32 %v4644_v26, %v1019_v48  ;;  %v1659_v32 = vmul.f32 %v4649_v1, %v1019_v48 }
 0x170   : > { %v1934_v50 = vpack.c.bf16 %v1650_v58, %v1646_v39  ;;  %v1652_v40 = vmul.f32 %v4654_v46, %v1007_v55  ;;  %v1656_v41 = vmul.f32 %v4659_v62, %v1007_v55  ;;  %v1654_v51 = vmul.f32 %v4664_v63, %v1015_v60 }
 0x171   : > { %2841 = vmatprep.subr.bf16.mxu1 %v1935_v59  ;;  %v1939_v52 = vpack.c.bf16 %v1659_v32, %v1655_v5  ;;  %v1658_v8 = vmul.f32 %v4714_v34, %v1015_v60  ;;  %v1027_v54 = vrot.slane %v551_v37, %v3697_v13  ;;  %v1035_v57 = vrot.slane %v551_v37, %v3699_v14 }
 0x172   : > { %2670 = vmatpush1.bf16.msra.mxu0 %v1932_v24  ;;  %2842 = vmatpush1.bf16.msra.mxu1 %v1934_v50  ;;  %v1936_v0 = vpack.c.bf16 %v1656_v41, %v1652_v40  ;;  %v1023_v3 = vrot.slane %v551_v37, %v3702_v17  ;;  %v1031_v20 = vrot.slane %v551_v37, %v3704_v18 }
 0x173   : > { %2671 = vmatprep.subr.bf16.mxu0 %v1937_v35  ;;  %2843 = vmatprep.subr.bf16.mxu1 %v1939_v52  ;;  %v1938_v38 = vpack.c.bf16 %v1658_v8, %v1654_v51  ;;  %v1661_v36 = vmul.f32 %v4687_v10, %v1027_v54  ;;  %v1665_v11 = vmul.f32 %v4691_v19, %v1027_v54 }
 0x174   : > { %v1663_v16 = vmul.f32 %v4695_v7, %v1035_v57  ;;  %v1667_v12 = vmul.f32 %v4699_v53, %v1035_v57  ;;  %v1660_v28 = vmul.f32 %v4614_v47, %v1023_v3  ;;  %v1664_v6 = vmul.f32 %v4619_v15, %v1023_v3 }
 0x175   : > { %v1941_v49 = vpack.c.bf16 %v1665_v11, %v1661_v36  ;;  %v1662_v31 = vmul.f32 %v4624_v25, %v1031_v20  ;;  %v1666_v29 = vmul.f32 %v4629_v23, %v1031_v20  ;;  %v1669_v30 = vmul.f32 %v4634_v9, %v1027_v54 }
 0x176   : > { %2672 = vmatpush1.bf16.msra.mxu0 %v1936_v0  ;;  %2844 = vmatpush1.bf16.msra.mxu1 %v1938_v38  ;;  %v1943_v44 = vpack.c.bf16 %v1667_v12, %v1663_v16  ;;  %v1940_v48 = vpack.c.bf16 %v1664_v6, %v1660_v28  ;;  %v1673_v55 = vmul.f32 %v4639_v43, %v1027_v54 }
 0x177   : > { %2673 = vmatprep.subr.bf16.mxu0 %v1941_v49  ;;  %v1942_v60 = vpack.c.bf16 %v1666_v29, %v1662_v31  ;;  %v1671_v21 = vmul.f32 %v4644_v26, %v1035_v57  ;;  %v1675_v2 = vmul.f32 %v4649_v1, %v1035_v57  ;;  %v1668_v61 = vmul.f32 %v4654_v46, %v1023_v3 }
 0x178   : > { %2845 = vmatprep.subr.bf16.mxu1 %v1943_v44  ;;  %v1945_v33 = vpack.c.bf16 %v1673_v55, %v1669_v30  ;;  %v1672_v56 = vmul.f32 %v4659_v62, %v1023_v3  ;;  %v1670_v45 = vmul.f32 %v4664_v63, %v1031_v20  ;;  %v1674_v27 = vmul.f32 %v4714_v34, %v1031_v20 }
 0x179   : > { %v1947_v39 = vpack.c.bf16 %v1675_v2, %v1671_v21  ;;  %v553_v58 = vcombine.high %v4676_v4, %v4676_v4  ;;  %v555_v35 = vcombine.high %v551_v37, %v551_v37 }
 0x17a   : > { %2674 = vmatpush1.bf16.msra.mxu0 %v1940_v48  ;;  %2846 = vmatpush1.bf16.msra.mxu1 %v1942_v60  ;;  %v1944_v59 = vpack.c.bf16 %v1672_v56, %v1668_v61  ;;  %v1946_v24 = vpack.c.bf16 %v1674_v27, %v1670_v45 }
 0x17b   : > { %2675 = vmatprep.subr.bf16.mxu0 %v1945_v33  ;;  %2847 = vmatprep.subr.bf16.mxu1 %v1947_v39  ;;  %v1043_v5 = vrot.slane %v553_v58, %v3697_v13  ;;  %v1051_v32 = vrot.slane %v553_v58, %v3699_v14  ;;  %v1039_v50 = vrot.slane %v553_v58, %v3702_v17 }
 0x17c   : > { %v1047_v40 = vrot.slane %v553_v58, %v3704_v18  ;;  %v1059_v41 = vrot.slane %v555_v35, %v3697_v13  ;;  %v1067_v51 = vrot.slane %v555_v35, %v3699_v14  ;;  %v1055_v4 = vrot.slane %v555_v35, %v3702_v17 }
 0x17d   : > { %v1677_v37 = vmul.f32 %v4687_v10, %v1043_v5  ;;  %v1681_v52 = vmul.f32 %v4691_v19, %v1043_v5  ;;  %v1679_v8 = vmul.f32 %v4695_v7, %v1051_v32  ;;  %v1683_v54 = vmul.f32 %v4699_v53, %v1051_v32 }
 0x17e   : > { %2676 = vmatpush1.bf16.msra.mxu0 %v1944_v59  ;;  %2848 = vmatpush1.bf16.msra.mxu1 %v1946_v24  ;;  %v1676_v57 = vmul.f32 %v4614_v47, %v1039_v50  ;;  %v1680_v0 = vmul.f32 %v4619_v15, %v1039_v50  ;;  %v1678_v13 = vmul.f32 %v4624_v25, %v1047_v40 }
 0x17f   : > { %v1949_v3 = vpack.c.bf16 %v1681_v52, %v1677_v37  ;;  %v1951_v14 = vpack.c.bf16 %v1683_v54, %v1679_v8  ;;  %v1682_v17 = vmul.f32 %v4629_v23, %v1047_v40  ;;  %v1685_v20 = vmul.f32 %v4634_v9, %v1043_v5 }
 0x180   : > { %v1948_v38 = vpack.c.bf16 %v1680_v0, %v1676_v57  ;;  %v1689_v36 = vmul.f32 %v4639_v43, %v1043_v5  ;;  %v1687_v11 = vmul.f32 %v4644_v26, %v1051_v32  ;;  %v1691_v16 = vmul.f32 %v4649_v1, %v1051_v32 }
 0x181   : > { %2677 = vmatprep.subr.bf16.mxu0 %v1949_v3  ;;  %2849 = vmatprep.subr.bf16.mxu1 %v1951_v14  ;;  %v1950_v12 = vpack.c.bf16 %v1682_v17, %v1678_v13  ;;  %v1684_v28 = vmul.f32 %v4654_v46, %v1039_v50  ;;  %v1688_v6 = vmul.f32 %v4659_v62, %v1039_v50 }
 0x182   : > { %2678 = vmatpush1.bf16.msra.mxu0 %v1948_v38  ;;  %v1953_v49 = vpack.c.bf16 %v1689_v36, %v1685_v20  ;;  %v1955_v31 = vpack.c.bf16 %v1691_v16, %v1687_v11  ;;  %v1686_v29 = vmul.f32 %v4664_v63, %v1047_v40  ;;  %v1690_v30 = vmul.f32 %v4714_v34, %v1047_v40 }
 0x183   : > { %2850 = vmatpush1.bf16.msra.mxu1 %v1950_v12  ;;  %v1952_v44 = vpack.c.bf16 %v1688_v6, %v1684_v28  ;;  %v1693_v48 = vmul.f32 %v4687_v10, %v1059_v41  ;;  %v1697_v55 = vmul.f32 %v4691_v19, %v1059_v41  ;;  %v1695_v60 = vmul.f32 %v4695_v7, %v1067_v51 }
 0x184   : > { %2679 = vmatprep.subr.bf16.mxu0 %v1953_v49  ;;  %2851 = vmatprep.subr.bf16.mxu1 %v1955_v31  ;;  %v1954_v21 = vpack.c.bf16 %v1690_v30, %v1686_v29  ;;  %v1699_v2 = vmul.f32 %v4699_v53, %v1067_v51  ;;  %v1692_v61 = vmul.f32 %v4614_v47, %v1055_v4 }
 0x185   : > { %v1957_v33 = vpack.c.bf16 %v1697_v55, %v1693_v48  ;;  %v1696_v56 = vmul.f32 %v4619_v15, %v1055_v4  ;;  %v1063_v45 = vrot.slane %v555_v35, %v3704_v18  ;;  %v1701_v27 = vmul.f32 %v4634_v9, %v1059_v41 }
 0x186   : > { %2680 = vmatpush1.bf16.msra.mxu0 %v1952_v44  ;;  %v1959_v10 = vpack.c.bf16 %v1699_v2, %v1695_v60  ;;  %v1705_v19 = vmul.f32 %v4639_v43, %v1059_v41  ;;  %v1703_v7 = vmul.f32 %v4644_v26, %v1067_v51  ;;  %v1707_v39 = vmul.f32 %v4649_v1, %v1067_v51 }
 0x187   : > { %2852 = vmatpush1.bf16.msra.mxu1 %v1954_v21  ;;  %2681 = vmatprep.subr.bf16.mxu0 %v1957_v33  ;;  %v1956_v53 = vpack.c.bf16 %v1696_v56, %v1692_v61  ;;  %v1694_v47 = vmul.f32 %v4624_v25, %v1063_v45  ;;  %v1698_v58 = vmul.f32 %v4629_v23, %v1063_v45 }
 0x188   : > { %2853 = vmatprep.subr.bf16.mxu1 %v1959_v10  ;;  %v1961_v15 = vpack.c.bf16 %v1705_v19, %v1701_v27  ;;  %v1963_v18 = vpack.c.bf16 %v1707_v39, %v1703_v7  ;;  %v1700_v9 = vmul.f32 %v4654_v46, %v1055_v4  ;;  %v1704_v35 = vmul.f32 %v4659_v62, %v1055_v4 }
 0x189   : > { %v1958_v43 = vpack.c.bf16 %v1698_v58, %v1694_v47  ;;  %v1702_v26 = vmul.f32 %v4664_v63, %v1063_v45  ;;  %v1706_v1 = vmul.f32 %v4714_v34, %v1063_v45  ;;  %v3023_v23 = vcombine.low %v4547_v42, %v4550_v22 }
 0x18a   : > { %2682 = vmatpush1.bf16.msra.mxu0 %v1956_v53  ;;  %v1960_v59 = vpack.c.bf16 %v1704_v35, %v1700_v9 }
 0x18b   : > { %2854 = vmatpush1.bf16.msra.mxu1 %v1958_v43  ;;  %2683 = vmatprep.subr.bf16.mxu0 %v1961_v15  ;;  %v1962_v25 = vpack.c.bf16 %v1706_v1, %v1702_v26 }
 0x18c   : > { %2855 = vmatprep.subr.bf16.mxu1 %v1963_v18 }
 0x18e   : > { %2684 = vmatpush1.bf16.msra.mxu0 %v1960_v59 }
 0x18f   : > { %2856 = vmatpush1.bf16.msra.mxu1 %v1962_v25 }
 0x191   : > { %2686 = vmatmul.mubr.bf16.vlgmr.msra.gmra.mrb[0].mxu0 %v3023_v23 }
 0x192   : > { %2858 = vmatmul.mubr.bf16.vlgmr.msra.gmra.mrb[0].mxu1 %v3023_v23 }
 0x264   : > { %v2687_v46 = vpop.f32.mrb[0].mxu0 }
 0x265   : > { %2868 = vst [vmem:[%s228_s21] sm:$0xff] %v2687_v46  ;;  %v2859_v62 = vpop.f32.mrb[0].mxu1  ;;  %v2689_v63 = vpop.f32.mrb[1].mxu0 }
 0x266   : > { %2870 = vst [vmem:[%s228_s21 + $0x10] sm:$0xff] %v2859_v62  ;;  %2869 = vst [vmem:[%s228_s21 + $0x8] sm:$0xff] %v2689_v63  ;;  %v2861_v42 = vpop.f32.mrb[1].mxu1  ;;  %v2691_v22 = vpop.f32.mrb[2].mxu0 }
 0x267   : > { %2871 = vst [vmem:[%s228_s21 + $0x18] sm:$0xff] %v2861_v42  ;;  %2872 = vst [vmem:[%s228_s21 + $0x20] sm:$0xff] %v2691_v22  ;;  %v2863_v34 = vpop.f32.mrb[2].mxu1  ;;  %v2693_v24 = vpop.f32.mrb[3].mxu0 }
 0x268   : > { %2874 = vst [vmem:[%s228_s21 + $0x30] sm:$0xff] %v2863_v34  ;;  %2873 = vst [vmem:[%s228_s21 + $0x28] sm:$0xff] %v2693_v24  ;;  %v2865_v5 = vpop.f32.mrb[3].mxu1 }
 0x269   : > { %2875 = vst [vmem:[%s228_s21 + $0x38] sm:$0xff] %v2865_v5 }
 0x26a   : > { %3297 = shalt.err (!%p3294_p8)
}
 0x26b   : > { %s3298_s12 = scalar_lea.hbm %s4811_s17, 1024  ;;  %s3302_s30 = scalar_lea.hbm %s4872_s3, 2048 }
 0x26c   : > { %p3299_p12 = scmp.ne.s32.totalorder %s4811_s17, %s3298_s12  ;;  %p3303_p13 = scmp.lt.u32.totalorder %s4811_s17, %s4872_s3 }
 0x26d   : > { %p3304_p3 = scmp.lt.u32.totalorder %s3302_s30, %s3298_s12  ;;  %p3306_p0 = scmp.lt.u32.totalorder %s3298_s12, %s4811_s17 }
 0x26e   : > { %p3300_p4 = pnand %p3299_p12, %p4902_p10 }
 0x26f   : > { %p3305_p1 = por %p3304_p3, %p3303_p13 }
 0x270   : > { %p3301_p9 = pneg %p3300_p4 }
 0x271   : > { %p3307_p2 = por %p3306_p0, %p3305_p1 }
 0x273   : > { %p3308_p6 = pnand %p3307_p2, %p3301_p9 }
 0x275   : > { %3311 = shalt.err (!%p3308_p6)
}
 0x276   : > { %s3405_s21 = smov 512   ;;  %s3406_s7 = smov 32  }
 0x277   : > { %3063 = dma.vmem_to_hbm [thread:$0]  (%p4902_p10), %s4806_s20, 1024, %s4811_s17, %s2877_s27, %s3405_s21, %s3405_s21, %s3406_s7  }
 0x278 PF: > { %s2908_s8 = sand.u32 1, %s3376_s25   ;;  %p4903_p11 = scmp.ne.s32.totalorder %s4887_s15, 0 }
 0x279   : > { %p4904_p7 = scmp.ge.s32.totalorder %s3396_s29, 2  ;;  %s2909_s16 = scalar_lea.sflag [#allocation7], %s2908_s8 }
 0x27b   : > { %p3075_p5 = pnand %p4904_p7, %p4903_p11 }
 0x27d   : > { %3359 = dma.done.wait (!%p3075_p5), %s2909_s16, 1024  }
 0x27e   : > { %3361 = vsyncadd (!%p3075_p5), %s2909_s16, 4294966272  ;;  %s26_s29 = sadd.s32 1, %s3396_s29   ;;  %s4905_s14 = sld [smem:[#allocation17_spill]] }
 0x27f   : > { %p23_p8 = scmp.ge.s32.totalorder %s26_s29, 4   ;;  %s4906_s22 = smov %s3368_s23 }
 0x280   : > { %s4907_s23 = smov %s3372_s24  ;;  %s4908_s24 = smov %s3609_s6 }
 0x281   : > { %s4909_s25 = smov %s3380_s26  ;;  %s4910_s26 = smov %s3384_s0 }
 0x282   : > { %s4911_s0 = smov %s3526_s13  ;;  %s4912_s27 = smov %s3392_s28 }
 0x283   :  { %25 = sbr.rel (!%p23_p8) target bundleno = 22 (0x16), region = 90 }
 0x284   : > { %s4913_s28 = smov %s4905_s14 }
 0x28a   :  { %2914 = vsyncpa [#allocation6], 1 }
 0x28b   :  { %2916 = vsyncpa [#allocation6 + $0x1], 1 }
 0x28c   :  { %2917 = vsyncpa [#allocation9], 1 }
 0x28d   :  { %2919 = vsyncpa [#allocation9 + $0x1], 1 }
 0x28e   :  { %2920 = vsyncpa [#allocation7], 1 }
 0x28f   :  { %2922 = vsyncpa [#allocation7 + $0x1], 1 }

</bundles_post_ra>
